<compile_context>
chip_gen: v7x
topology: tpu7x:2x2x1
jax: 0.10.0
libtpu: 0.0.40
codegen_flags: <defaults>
</compile_context>

<pallas_src>
import functools

import jax
import jax.numpy as jnp
from jax import lax
from jax.experimental import pallas as pl
from jax.experimental.pallas import tpu as pltpu


# ----------------------------------------------------------------------------
# In-kernel helpers (traced inline inside the single fused kernel)
# ----------------------------------------------------------------------------

def _gn_silu(x, gamma, beta, gsum_ref, groups):
    """Fused GroupNorm(groups, eps=1e-5, affine=True) + SiLU, token-major.

    x:        (HW, C) f32 activation of ONE batch element.
    gamma:    (1, C), beta: (1, C) per-channel affine.
    gsum_ref: (C, C) same-group indicator matrix (only read when C//groups > 1;
              it aggregates per-channel stats into per-group stats without any
              in-kernel reshape/relayout).
    """
    HW, C = x.shape
    Cg = C // groups
    inv_n = 1.0 / float(Cg * HW)

    s = jnp.sum(x, axis=0, keepdims=True)                        # (1, C)
    if Cg == 1:                                                   # static branch
        mean = s * inv_n
    else:
        mean = jnp.dot(s, gsum_ref[...],
                       preferred_element_type=jnp.float32) * inv_n
    d = x - mean                                                  # (HW, C)
    ss = jnp.sum(d * d, axis=0, keepdims=True)                    # (1, C)
    if Cg == 1:
        var = ss * inv_n
    else:
        var = jnp.dot(ss, gsum_ref[...],
                      preferred_element_type=jnp.float32) * inv_n
    y = d * lax.rsqrt(var + 1e-5) * gamma + beta
    return y * jax.nn.sigmoid(y)                                  # SiLU


def _conv3x3(a, m_kw0, m_kw2, w_ref, b_ref, W):
    """3x3 / stride 1 / pad 1 conv of a token-major slab, entirely in VMEM.

    a:      (HW, Cin) f32 conv input (one batch element).
    m_kw0:  (HW, 1) mask zeroing SOURCE rows whose spatial column j == W-1
            (these are the wrap-around sources of every kw=0 tap).
    m_kw2:  (HW, 1) mask zeroing SOURCE rows whose spatial column j == 0
            (wrap-around sources of every kw=2 tap).
    w_ref:  (9*Cin, Cout) weights, rows ordered (kh, kw, ci).
    b_ref:  (1, Cout) bias.

    tap_{kh,kw}[i] = a[i + (kh-1)*W + (kw-1)] with zero padding.  Row bounds
    are realised by a (W+1)-row zero pad above/below the slab; column bounds
    by the two source masks above.  Each tap feeds one MXU matmul accumulated
    in f32 -- no im2col buffer ever touches HBM.
    """
    HW, Cin = a.shape
    Cout = w_ref.shape[1]
    P = W + 1                                      # pad rows each side >= |off|
    zpad = jnp.zeros((P, Cin), jnp.float32)

    # One padded, source-masked slab per kw value (kw = 0, 1, 2).
    slabs = (
        jnp.concatenate([zpad, a * m_kw0, zpad], axis=0),   # kw = 0 taps
        jnp.concatenate([zpad, a,         zpad], axis=0),   # kw = 1 taps
        jnp.concatenate([zpad, a * m_kw2, zpad], axis=0),   # kw = 2 taps
    )

    acc = jnp.zeros((HW, Cout), jnp.float32)
    for kh in range(3):
        for kw in range(3):
            off = (kh - 1) * W + (kw - 1)          # flat row offset of this tap
            tap = slabs[kw][P + off:P + off + HW, :]
            t = kh * 3 + kw
            acc = acc + jnp.dot(tap, w_ref[t * Cin:(t + 1) * Cin, :],
                                preferred_element_type=jnp.float32)
    return acc + b_ref[...]


def _resnet_kernel(x_ref, jm_ref, gsum1_ref, gsum2_ref,
                   g1_ref, b1_ref, w1_ref, c1_ref,
                   g2_ref, b2_ref, w2_ref, c2_ref,
                   wsc_ref, csc_ref, out_ref, *, W, groups):
    x = x_ref[0]                        # (HW, Cin) f32, one batch element
    m_kw0 = jm_ref[:, 0:1]              # (HW, 1): j != W-1
    m_kw2 = jm_ref[:, 1:2]              # (HW, 1): j != 0

    # shortcut = Conv3x3(input)
    sc = _conv3x3(x, m_kw0, m_kw2, wsc_ref, csc_ref, W)

    # h = Conv3x3(SiLU(GroupNorm1(input)))
    a1 = _gn_silu(x, g1_ref[...], b1_ref[...], gsum1_ref, groups)
    h = _conv3x3(a1, m_kw0, m_kw2, w1_ref, c1_ref, W)

    # h = Conv3x3(Dropout_{p=0}(SiLU(GroupNorm2(h))))  -- Dropout(0.0) == identity
    a2 = _gn_silu(h, g2_ref[...], b2_ref[...], gsum2_ref, groups)
    h = _conv3x3(a2, m_kw0, m_kw2, w2_ref, c2_ref, W)

    out_ref[0] = (h + sc).astype(out_ref.dtype)


# ----------------------------------------------------------------------------
# Wrapper: one pallas_call for the whole Resnet forward
# ----------------------------------------------------------------------------

def _group_indicator(C, groups):
    g = jnp.arange(C, dtype=jnp.int32) // (C // groups)
    return (g[:, None] == g[None, :]).astype(jnp.float32)         # (C, C)


def _conv_weight_k(w):
    """(Cout, Cin, 3, 3) -> (9*Cin, Cout), rows ordered (kh, kw, ci)."""
    co, ci = w.shape[0], w.shape[1]
    return jnp.transpose(w, (2, 3, 1, 0)).reshape(9 * ci, co)


def resnet_forward(x, params, groups=32):
    """Fused Pallas forward of the PyTorch `Resnet` module.  x: (B, Cin, H, W)."""
    B, Cin, H, W = x.shape
    Cout = params['conv1_w'].shape[0]
    HW = H * W

    # The only NCHW <-> token-major conversions happen here, at the boundary.
    x_tm = jnp.transpose(x, (0, 2, 3, 1)).reshape(B, HW, Cin)

    # Source-side column-boundary masks (see _conv3x3).
    j = jnp.arange(HW, dtype=jnp.int32) % W
    jmask = jnp.stack([(j != W - 1), (j != 0)], axis=1).astype(jnp.float32)

    args = (
        x_tm,                                                     # (B, HW, Cin)
        jmask,                                                    # (HW, 2)
        _group_indicator(Cin, groups),                            # (Cin, Cin)
        _group_indicator(Cout, groups),                           # (Cout, Cout)
        params['norm1_g'].reshape(1, Cin), params['norm1_b'].reshape(1, Cin),
        _conv_weight_k(params['conv1_w']), params['conv1_b'].reshape(1, Cout),
        params['norm2_g'].reshape(1, Cout), params['norm2_b'].reshape(1, Cout),
        _conv_weight_k(params['conv2_w']), params['conv2_b'].reshape(1, Cout),
        _conv_weight_k(params['shortcut_w']), params['shortcut_b'].reshape(1, Cout),
    )

    def _full(a):
        return pl.BlockSpec(a.shape, lambda b, _nd=a.ndim: (0,) * _nd)

    in_specs = ([pl.BlockSpec((1, HW, Cin), lambda b: (b, 0, 0))]
                + [_full(a) for a in args[1:]])

    out = pl.pallas_call(
        functools.partial(_resnet_kernel, W=W, groups=groups),
        out_shape=jax.ShapeDtypeStruct((B, HW, Cout), jnp.float32),
        grid=(B,),
        in_specs=in_specs,
        out_specs=pl.BlockSpec((1, HW, Cout), lambda b: (b, 0, 0)),
        compiler_params=pltpu.CompilerParams(
            dimension_semantics=("parallel",)),
    )(*args)

    return jnp.transpose(out.reshape(B, H, W, Cout), (0, 3, 1, 2))


# ----------------------------------------------------------------------------
# Pure-JAX reference (mirrors the PyTorch module) for a correctness check
# ----------------------------------------------------------------------------

def _ref_forward(x, p, groups=32):
    def gn_silu(h, g, b):
        B, C, H, W = h.shape
        hg = h.reshape(B, groups, -1)
        m = hg.mean(-1, keepdims=True)
        v = ((hg - m) ** 2).mean(-1, keepdims=True)
        hn = ((hg - m) / jnp.sqrt(v + 1e-5)).reshape(B, C, H, W)
        hn = hn * g[None, :, None, None] + b[None, :, None, None]
        return hn * jax.nn.sigmoid(hn)

    def conv(h, w, b):
        y = lax.conv_general_dilated(h, w, (1, 1), ((1, 1), (1, 1)),
                                     dimension_numbers=('NCHW', 'OIHW', 'NCHW'))
        return y + b[None, :, None, None]

    h = gn_silu(x, p['norm1_g'], p['norm1_b'])
    h = conv(h, p['conv1_w'], p['conv1_b'])
    h = gn_silu(h, p['norm2_g'], p['norm2_b'])
    h = conv(h, p['conv2_w'], p['conv2_b'])
    return h + conv(x, p['shortcut_w'], p['shortcut_b'])


# ----------------------------------------------------------------------------
# Main
# ----------------------------------------------------------------------------

if __name__ == "__main__":
    key = jax.random.PRNGKey(0)
    kx, kp = jax.random.split(key)

    # GroupNorm(32, C) requires C % 32 == 0 -> smallest valid channel count is 32.
    B, C, H, W = 2, 32, 8, 8

    ks = iter(jax.random.split(kp, 16))
    rnd = lambda shape, s=0.05: jax.random.normal(next(ks), shape, jnp.float32) * s
    params = dict(
        norm1_g=1.0 + rnd((C,)), norm1_b=rnd((C,)),
        conv1_w=rnd((C, C, 3, 3)), conv1_b=rnd((C,)),
        norm2_g=1.0 + rnd((C,)), norm2_b=rnd((C,)),
        conv2_w=rnd((C, C, 3, 3)), conv2_b=rnd((C,)),
        shortcut_w=rnd((C, C, 3, 3)), shortcut_b=rnd((C,)),
    )
    x = jax.random.normal(kx, (B, C, H, W), jnp.float32)

    out = jax.block_until_ready(jax.jit(resnet_forward)(x, params))
    assert out.shape == (B, C, H, W), out.shape
    assert out.dtype == jnp.float32
    assert bool(jnp.all(jnp.isfinite(out)))

    ref = jax.block_until_ready(_ref_forward(x, params))
    err = float(jnp.max(jnp.abs(out - ref)))
    assert err < 1e-4, f"max |err| = {err}"

    print("KERNEL_OK")
</pallas_src>

<mosaic_0001>
module attributes {stable_mosaic.version = 11 : i64} {
  func.func @_resnet_kernel(%arg0: i32, %arg1: memref<1x64x32xf32, #tpu.memory_space<vmem>>, %arg2: memref<64x2xf32, #tpu.memory_space<vmem>>, %arg3: memref<32x32xf32, #tpu.memory_space<vmem>>, %arg4: memref<32x32xf32, #tpu.memory_space<vmem>>, %arg5: memref<1x32xf32, #tpu.memory_space<vmem>>, %arg6: memref<1x32xf32, #tpu.memory_space<vmem>>, %arg7: memref<288x32xf32, #tpu.memory_space<vmem>>, %arg8: memref<1x32xf32, #tpu.memory_space<vmem>>, %arg9: memref<1x32xf32, #tpu.memory_space<vmem>>, %arg10: memref<1x32xf32, #tpu.memory_space<vmem>>, %arg11: memref<288x32xf32, #tpu.memory_space<vmem>>, %arg12: memref<1x32xf32, #tpu.memory_space<vmem>>, %arg13: memref<288x32xf32, #tpu.memory_space<vmem>>, %arg14: memref<1x32xf32, #tpu.memory_space<vmem>>, %arg15: memref<1x64x32xf32, #tpu.memory_space<vmem>>) attributes {dimension_semantics = [#tpu.dimension_semantics<parallel>], iteration_bounds = array<i64: 2>, scalar_prefetch = 0 : i64, scratch_operands = 0 : i64, tpu.core_type = #tpu.core_type<tc>, window_params = [{transform_indices = @transform_0, window_bounds = array<i64: 1, 64, 32>}, {pipeline_mode = #tpu.pipeline_mode<synchronous>, transform_indices = @transform_1, window_bounds = array<i64: 64, 2>}, {pipeline_mode = #tpu.pipeline_mode<synchronous>, transform_indices = @transform_2, window_bounds = array<i64: 32, 32>}, {pipeline_mode = #tpu.pipeline_mode<synchronous>, transform_indices = @transform_3, window_bounds = array<i64: 32, 32>}, {pipeline_mode = #tpu.pipeline_mode<synchronous>, transform_indices = @transform_4, window_bounds = array<i64: 1, 32>}, {pipeline_mode = #tpu.pipeline_mode<synchronous>, transform_indices = @transform_5, window_bounds = array<i64: 1, 32>}, {pipeline_mode = #tpu.pipeline_mode<synchronous>, transform_indices = @transform_6, window_bounds = array<i64: 288, 32>}, {pipeline_mode = #tpu.pipeline_mode<synchronous>, transform_indices = @transform_7, window_bounds = array<i64: 1, 32>}, {pipeline_mode = #tpu.pipeline_mode<synchronous>, transform_indices = @transform_8, window_bounds = array<i64: 1, 32>}, {pipeline_mode = #tpu.pipeline_mode<synchronous>, transform_indices = @transform_9, window_bounds = array<i64: 1, 32>}, {pipeline_mode = #tpu.pipeline_mode<synchronous>, transform_indices = @transform_10, window_bounds = array<i64: 288, 32>}, {pipeline_mode = #tpu.pipeline_mode<synchronous>, transform_indices = @transform_11, window_bounds = array<i64: 1, 32>}, {pipeline_mode = #tpu.pipeline_mode<synchronous>, transform_indices = @transform_12, window_bounds = array<i64: 288, 32>}, {pipeline_mode = #tpu.pipeline_mode<synchronous>, transform_indices = @transform_13, window_bounds = array<i64: 1, 32>}, {transform_indices = @transform_14, window_bounds = array<i64: 1, 64, 32>}]} {
    %c0 = arith.constant 0 : index
    %c0_0 = arith.constant 0 : index
    %c0_1 = arith.constant 0 : index
    %0 = vector.load %arg1[%c0, %c0_0, %c0_1] : memref<1x64x32xf32, #tpu.memory_space<vmem>>, vector<1x64x32xf32>
    %1 = vector.shape_cast %0 : vector<1x64x32xf32> to vector<64x32xf32>
    %c0_2 = arith.constant 0 : index
    %c0_3 = arith.constant 0 : index
    %2 = vector.load %arg2[%c0_2, %c0_3] : memref<64x2xf32, #tpu.memory_space<vmem>>, vector<64x1xf32>
    %c0_4 = arith.constant 0 : index
    %c1 = arith.constant 1 : index
    %3 = vector.load %arg2[%c0_4, %c1] : memref<64x2xf32, #tpu.memory_space<vmem>>, vector<64x1xf32>
    %cst = arith.constant 0.000000e+00 : f32
    %4 = vector.broadcast %cst : f32 to vector<9x32xf32>
    %5 = vector.broadcast %2 : vector<64x1xf32> to vector<64x32xf32>
    %6 = arith.mulf %1, %5 : vector<64x32xf32>
    %7 = tpu.concatenate %4, %6, %4 in 0 : vector<9x32xf32>, vector<64x32xf32>, vector<9x32xf32> -> vector<82x32xf32>
    %8 = tpu.concatenate %4, %1, %4 in 0 : vector<9x32xf32>, vector<64x32xf32>, vector<9x32xf32> -> vector<82x32xf32>
    %9 = vector.broadcast %3 : vector<64x1xf32> to vector<64x32xf32>
    %10 = arith.mulf %1, %9 : vector<64x32xf32>
    %11 = tpu.concatenate %4, %10, %4 in 0 : vector<9x32xf32>, vector<64x32xf32>, vector<9x32xf32> -> vector<82x32xf32>
    %cst_5 = arith.constant 0.000000e+00 : f32
    %12 = vector.broadcast %cst_5 : f32 to vector<64x32xf32>
    %13 = vector.extract_strided_slice %7 {offsets = [0, 0], sizes = [64, 32], strides = [1, 1]} : vector<82x32xf32> to vector<64x32xf32>
    %c0_6 = arith.constant 0 : index
    %c0_7 = arith.constant 0 : index
    %14 = vector.load %arg13[%c0_6, %c0_7] : memref<288x32xf32, #tpu.memory_space<vmem>>, vector<32x32xf32>
    %cst_8 = arith.constant dense<0.000000e+00> : vector<64x32xf32>
    %15 = tpu.matmul %13, %14, %cst_8 {dimension_numbers = #tpu.dot_dimension_numbers<[1], [0], [0], [1], [0, 0, 1, 1], [], []>} : vector<64x32xf32>, vector<32x32xf32>, vector<64x32xf32> -> vector<64x32xf32>
    %16 = arith.addf %12, %15 : vector<64x32xf32>
    %17 = vector.extract_strided_slice %8 {offsets = [1, 0], sizes = [64, 32], strides = [1, 1]} : vector<82x32xf32> to vector<64x32xf32>
    %c32 = arith.constant 32 : index
    %c0_9 = arith.constant 0 : index
    %18 = vector.load %arg13[%c32, %c0_9] : memref<288x32xf32, #tpu.memory_space<vmem>>, vector<32x32xf32>
    %cst_10 = arith.constant dense<0.000000e+00> : vector<64x32xf32>
    %19 = tpu.matmul %17, %18, %cst_10 {dimension_numbers = #tpu.dot_dimension_numbers<[1], [0], [0], [1], [0, 0, 1, 1], [], []>} : vector<64x32xf32>, vector<32x32xf32>, vector<64x32xf32> -> vector<64x32xf32>
    %20 = arith.addf %16, %19 : vector<64x32xf32>
    %21 = vector.extract_strided_slice %11 {offsets = [2, 0], sizes = [64, 32], strides = [1, 1]} : vector<82x32xf32> to vector<64x32xf32>
    %c64 = arith.constant 64 : index
    %c0_11 = arith.constant 0 : index
    %22 = vector.load %arg13[%c64, %c0_11] : memref<288x32xf32, #tpu.memory_space<vmem>>, vector<32x32xf32>
    %cst_12 = arith.constant dense<0.000000e+00> : vector<64x32xf32>
    %23 = tpu.matmul %21, %22, %cst_12 {dimension_numbers = #tpu.dot_dimension_numbers<[1], [0], [0], [1], [0, 0, 1, 1], [], []>} : vector<64x32xf32>, vector<32x32xf32>, vector<64x32xf32> -> vector<64x32xf32>
    %24 = arith.addf %20, %23 : vector<64x32xf32>
    %25 = vector.extract_strided_slice %7 {offsets = [8, 0], sizes = [64, 32], strides = [1, 1]} : vector<82x32xf32> to vector<64x32xf32>
    %c96 = arith.constant 96 : index
    %c0_13 = arith.constant 0 : index
    %26 = vector.load %arg13[%c96, %c0_13] : memref<288x32xf32, #tpu.memory_space<vmem>>, vector<32x32xf32>
    %cst_14 = arith.constant dense<0.000000e+00> : vector<64x32xf32>
    %27 = tpu.matmul %25, %26, %cst_14 {dimension_numbers = #tpu.dot_dimension_numbers<[1], [0], [0], [1], [0, 0, 1, 1], [], []>} : vector<64x32xf32>, vector<32x32xf32>, vector<64x32xf32> -> vector<64x32xf32>
    %28 = arith.addf %24, %27 : vector<64x32xf32>
    %29 = vector.extract_strided_slice %8 {offsets = [9, 0], sizes = [64, 32], strides = [1, 1]} : vector<82x32xf32> to vector<64x32xf32>
    %c128 = arith.constant 128 : index
    %c0_15 = arith.constant 0 : index
    %30 = vector.load %arg13[%c128, %c0_15] : memref<288x32xf32, #tpu.memory_space<vmem>>, vector<32x32xf32>
    %cst_16 = arith.constant dense<0.000000e+00> : vector<64x32xf32>
    %31 = tpu.matmul %29, %30, %cst_16 {dimension_numbers = #tpu.dot_dimension_numbers<[1], [0], [0], [1], [0, 0, 1, 1], [], []>} : vector<64x32xf32>, vector<32x32xf32>, vector<64x32xf32> -> vector<64x32xf32>
    %32 = arith.addf %28, %31 : vector<64x32xf32>
    %33 = vector.extract_strided_slice %11 {offsets = [10, 0], sizes = [64, 32], strides = [1, 1]} : vector<82x32xf32> to vector<64x32xf32>
    %c160 = arith.constant 160 : index
    %c0_17 = arith.constant 0 : index
    %34 = vector.load %arg13[%c160, %c0_17] : memref<288x32xf32, #tpu.memory_space<vmem>>, vector<32x32xf32>
    %cst_18 = arith.constant dense<0.000000e+00> : vector<64x32xf32>
    %35 = tpu.matmul %33, %34, %cst_18 {dimension_numbers = #tpu.dot_dimension_numbers<[1], [0], [0], [1], [0, 0, 1, 1], [], []>} : vector<64x32xf32>, vector<32x32xf32>, vector<64x32xf32> -> vector<64x32xf32>
    %36 = arith.addf %32, %35 : vector<64x32xf32>
    %37 = vector.extract_strided_slice %7 {offsets = [16, 0], sizes = [64, 32], strides = [1, 1]} : vector<82x32xf32> to vector<64x32xf32>
    %c192 = arith.constant 192 : index
    %c0_19 = arith.constant 0 : index
    %38 = vector.load %arg13[%c192, %c0_19] : memref<288x32xf32, #tpu.memory_space<vmem>>, vector<32x32xf32>
    %cst_20 = arith.constant dense<0.000000e+00> : vector<64x32xf32>
    %39 = tpu.matmul %37, %38, %cst_20 {dimension_numbers = #tpu.dot_dimension_numbers<[1], [0], [0], [1], [0, 0, 1, 1], [], []>} : vector<64x32xf32>, vector<32x32xf32>, vector<64x32xf32> -> vector<64x32xf32>
    %40 = arith.addf %36, %39 : vector<64x32xf32>
    %41 = vector.extract_strided_slice %8 {offsets = [17, 0], sizes = [64, 32], strides = [1, 1]} : vector<82x32xf32> to vector<64x32xf32>
    %c224 = arith.constant 224 : index
    %c0_21 = arith.constant 0 : index
    %42 = vector.load %arg13[%c224, %c0_21] : memref<288x32xf32, #tpu.memory_space<vmem>>, vector<32x32xf32>
    %cst_22 = arith.constant dense<0.000000e+00> : vector<64x32xf32>
    %43 = tpu.matmul %41, %42, %cst_22 {dimension_numbers = #tpu.dot_dimension_numbers<[1], [0], [0], [1], [0, 0, 1, 1], [], []>} : vector<64x32xf32>, vector<32x32xf32>, vector<64x32xf32> -> vector<64x32xf32>
    %44 = arith.addf %40, %43 : vector<64x32xf32>
    %45 = vector.extract_strided_slice %11 {offsets = [18, 0], sizes = [64, 32], strides = [1, 1]} : vector<82x32xf32> to vector<64x32xf32>
    %c256 = arith.constant 256 : index
    %c0_23 = arith.constant 0 : index
    %46 = vector.load %arg13[%c256, %c0_23] : memref<288x32xf32, #tpu.memory_space<vmem>>, vector<32x32xf32>
    %cst_24 = arith.constant dense<0.000000e+00> : vector<64x32xf32>
    %47 = tpu.matmul %45, %46, %cst_24 {dimension_numbers = #tpu.dot_dimension_numbers<[1], [0], [0], [1], [0, 0, 1, 1], [], []>} : vector<64x32xf32>, vector<32x32xf32>, vector<64x32xf32> -> vector<64x32xf32>
    %48 = arith.addf %44, %47 : vector<64x32xf32>
    %c0_25 = arith.constant 0 : index
    %c0_26 = arith.constant 0 : index
    %49 = vector.load %arg14[%c0_25, %c0_26] : memref<1x32xf32, #tpu.memory_space<vmem>>, vector<1x32xf32>
    %50 = vector.broadcast %49 : vector<1x32xf32> to vector<64x32xf32>
    %51 = arith.addf %48, %50 : vector<64x32xf32>
    %c0_27 = arith.constant 0 : index
    %c0_28 = arith.constant 0 : index
    %52 = vector.load %arg5[%c0_27, %c0_28] : memref<1x32xf32, #tpu.memory_space<vmem>>, vector<1x32xf32>
    %c0_29 = arith.constant 0 : index
    %c0_30 = arith.constant 0 : index
    %53 = vector.load %arg6[%c0_29, %c0_30] : memref<1x32xf32, #tpu.memory_space<vmem>>, vector<1x32xf32>
    %cst_31 = arith.constant dense<0.000000e+00> : vector<32xf32>
    %54 = vector.multi_reduction <add>, %1, %cst_31 [0] : vector<64x32xf32> to vector<32xf32>
    %55 = vector.shape_cast %54 : vector<32xf32> to vector<1x32xf32>
    %cst_32 = arith.constant 1.562500e-02 : f32
    %56 = vector.broadcast %cst_32 : f32 to vector<1x32xf32>
    %57 = arith.mulf %55, %56 : vector<1x32xf32>
    %58 = vector.broadcast %57 : vector<1x32xf32> to vector<64x32xf32>
    %59 = arith.subf %1, %58 : vector<64x32xf32>
    %60 = arith.mulf %59, %59 : vector<64x32xf32>
    %cst_33 = arith.constant dense<0.000000e+00> : vector<32xf32>
    %61 = vector.multi_reduction <add>, %60, %cst_33 [0] : vector<64x32xf32> to vector<32xf32>
    %62 = vector.shape_cast %61 : vector<32xf32> to vector<1x32xf32>
    %cst_34 = arith.constant 1.562500e-02 : f32
    %63 = vector.broadcast %cst_34 : f32 to vector<1x32xf32>
    %64 = arith.mulf %62, %63 : vector<1x32xf32>
    %cst_35 = arith.constant 9.99999974E-6 : f32
    %65 = vector.broadcast %cst_35 : f32 to vector<1x32xf32>
    %66 = arith.addf %64, %65 : vector<1x32xf32>
    %67 = math.rsqrt %66 : vector<1x32xf32>
    %68 = vector.broadcast %67 : vector<1x32xf32> to vector<64x32xf32>
    %69 = arith.mulf %59, %68 : vector<64x32xf32>
    %70 = vector.broadcast %52 : vector<1x32xf32> to vector<64x32xf32>
    %71 = arith.mulf %69, %70 : vector<64x32xf32>
    %72 = vector.broadcast %53 : vector<1x32xf32> to vector<64x32xf32>
    %73 = arith.addf %71, %72 : vector<64x32xf32>
    %74 = arith.negf %73 : vector<64x32xf32>
    %75 = math.exp %74 : vector<64x32xf32>
    %cst_36 = arith.constant 1.000000e+00 : f32
    %76 = vector.broadcast %cst_36 : f32 to vector<64x32xf32>
    %77 = arith.addf %76, %75 : vector<64x32xf32>
    %78 = arith.divf %76, %77 : vector<64x32xf32>
    %79 = arith.mulf %73, %78 : vector<64x32xf32>
    %cst_37 = arith.constant 0.000000e+00 : f32
    %80 = vector.broadcast %cst_37 : f32 to vector<9x32xf32>
    %81 = vector.broadcast %2 : vector<64x1xf32> to vector<64x32xf32>
    %82 = arith.mulf %79, %81 : vector<64x32xf32>
    %83 = tpu.concatenate %80, %82, %80 in 0 : vector<9x32xf32>, vector<64x32xf32>, vector<9x32xf32> -> vector<82x32xf32>
    %84 = tpu.concatenate %80, %79, %80 in 0 : vector<9x32xf32>, vector<64x32xf32>, vector<9x32xf32> -> vector<82x32xf32>
    %85 = vector.broadcast %3 : vector<64x1xf32> to vector<64x32xf32>
    %86 = arith.mulf %79, %85 : vector<64x32xf32>
    %87 = tpu.concatenate %80, %86, %80 in 0 : vector<9x32xf32>, vector<64x32xf32>, vector<9x32xf32> -> vector<82x32xf32>
    %cst_38 = arith.constant 0.000000e+00 : f32
    %88 = vector.broadcast %cst_38 : f32 to vector<64x32xf32>
    %89 = vector.extract_strided_slice %83 {offsets = [0, 0], sizes = [64, 32], strides = [1, 1]} : vector<82x32xf32> to vector<64x32xf32>
    %c0_39 = arith.constant 0 : index
    %c0_40 = arith.constant 0 : index
    %90 = vector.load %arg7[%c0_39, %c0_40] : memref<288x32xf32, #tpu.memory_space<vmem>>, vector<32x32xf32>
    %cst_41 = arith.constant dense<0.000000e+00> : vector<64x32xf32>
    %91 = tpu.matmul %89, %90, %cst_41 {dimension_numbers = #tpu.dot_dimension_numbers<[1], [0], [0], [1], [0, 0, 1, 1], [], []>} : vector<64x32xf32>, vector<32x32xf32>, vector<64x32xf32> -> vector<64x32xf32>
    %92 = arith.addf %88, %91 : vector<64x32xf32>
    %93 = vector.extract_strided_slice %84 {offsets = [1, 0], sizes = [64, 32], strides = [1, 1]} : vector<82x32xf32> to vector<64x32xf32>
    %c32_42 = arith.constant 32 : index
    %c0_43 = arith.constant 0 : index
    %94 = vector.load %arg7[%c32_42, %c0_43] : memref<288x32xf32, #tpu.memory_space<vmem>>, vector<32x32xf32>
    %cst_44 = arith.constant dense<0.000000e+00> : vector<64x32xf32>
    %95 = tpu.matmul %93, %94, %cst_44 {dimension_numbers = #tpu.dot_dimension_numbers<[1], [0], [0], [1], [0, 0, 1, 1], [], []>} : vector<64x32xf32>, vector<32x32xf32>, vector<64x32xf32> -> vector<64x32xf32>
    %96 = arith.addf %92, %95 : vector<64x32xf32>
    %97 = vector.extract_strided_slice %87 {offsets = [2, 0], sizes = [64, 32], strides = [1, 1]} : vector<82x32xf32> to vector<64x32xf32>
    %c64_45 = arith.constant 64 : index
    %c0_46 = arith.constant 0 : index
    %98 = vector.load %arg7[%c64_45, %c0_46] : memref<288x32xf32, #tpu.memory_space<vmem>>, vector<32x32xf32>
    %cst_47 = arith.constant dense<0.000000e+00> : vector<64x32xf32>
    %99 = tpu.matmul %97, %98, %cst_47 {dimension_numbers = #tpu.dot_dimension_numbers<[1], [0], [0], [1], [0, 0, 1, 1], [], []>} : vector<64x32xf32>, vector<32x32xf32>, vector<64x32xf32> -> vector<64x32xf32>
    %100 = arith.addf %96, %99 : vector<64x32xf32>
    %101 = vector.extract_strided_slice %83 {offsets = [8, 0], sizes = [64, 32], strides = [1, 1]} : vector<82x32xf32> to vector<64x32xf32>
    %c96_48 = arith.constant 96 : index
    %c0_49 = arith.constant 0 : index
    %102 = vector.load %arg7[%c96_48, %c0_49] : memref<288x32xf32, #tpu.memory_space<vmem>>, vector<32x32xf32>
    %cst_50 = arith.constant dense<0.000000e+00> : vector<64x32xf32>
    %103 = tpu.matmul %101, %102, %cst_50 {dimension_numbers = #tpu.dot_dimension_numbers<[1], [0], [0], [1], [0, 0, 1, 1], [], []>} : vector<64x32xf32>, vector<32x32xf32>, vector<64x32xf32> -> vector<64x32xf32>
    %104 = arith.addf %100, %103 : vector<64x32xf32>
    %105 = vector.extract_strided_slice %84 {offsets = [9, 0], sizes = [64, 32], strides = [1, 1]} : vector<82x32xf32> to vector<64x32xf32>
    %c128_51 = arith.constant 128 : index
    %c0_52 = arith.constant 0 : index
    %106 = vector.load %arg7[%c128_51, %c0_52] : memref<288x32xf32, #tpu.memory_space<vmem>>, vector<32x32xf32>
    %cst_53 = arith.constant dense<0.000000e+00> : vector<64x32xf32>
    %107 = tpu.matmul %105, %106, %cst_53 {dimension_numbers = #tpu.dot_dimension_numbers<[1], [0], [0], [1], [0, 0, 1, 1], [], []>} : vector<64x32xf32>, vector<32x32xf32>, vector<64x32xf32> -> vector<64x32xf32>
    %108 = arith.addf %104, %107 : vector<64x32xf32>
    %109 = vector.extract_strided_slice %87 {offsets = [10, 0], sizes = [64, 32], strides = [1, 1]} : vector<82x32xf32> to vector<64x32xf32>
    %c160_54 = arith.constant 160 : index
    %c0_55 = arith.constant 0 : index
    %110 = vector.load %arg7[%c160_54, %c0_55] : memref<288x32xf32, #tpu.memory_space<vmem>>, vector<32x32xf32>
    %cst_56 = arith.constant dense<0.000000e+00> : vector<64x32xf32>
    %111 = tpu.matmul %109, %110, %cst_56 {dimension_numbers = #tpu.dot_dimension_numbers<[1], [0], [0], [1], [0, 0, 1, 1], [], []>} : vector<64x32xf32>, vector<32x32xf32>, vector<64x32xf32> -> vector<64x32xf32>
    %112 = arith.addf %108, %111 : vector<64x32xf32>
    %113 = vector.extract_strided_slice %83 {offsets = [16, 0], sizes = [64, 32], strides = [1, 1]} : vector<82x32xf32> to vector<64x32xf32>
    %c192_57 = arith.constant 192 : index
    %c0_58 = arith.constant 0 : index
    %114 = vector.load %arg7[%c192_57, %c0_58] : memref<288x32xf32, #tpu.memory_space<vmem>>, vector<32x32xf32>
    %cst_59 = arith.constant dense<0.000000e+00> : vector<64x32xf32>
    %115 = tpu.matmul %113, %114, %cst_59 {dimension_numbers = #tpu.dot_dimension_numbers<[1], [0], [0], [1], [0, 0, 1, 1], [], []>} : vector<64x32xf32>, vector<32x32xf32>, vector<64x32xf32> -> vector<64x32xf32>
    %116 = arith.addf %112, %115 : vector<64x32xf32>
    %117 = vector.extract_strided_slice %84 {offsets = [17, 0], sizes = [64, 32], strides = [1, 1]} : vector<82x32xf32> to vector<64x32xf32>
    %c224_60 = arith.constant 224 : index
    %c0_61 = arith.constant 0 : index
    %118 = vector.load %arg7[%c224_60, %c0_61] : memref<288x32xf32, #tpu.memory_space<vmem>>, vector<32x32xf32>
    %cst_62 = arith.constant dense<0.000000e+00> : vector<64x32xf32>
    %119 = tpu.matmul %117, %118, %cst_62 {dimension_numbers = #tpu.dot_dimension_numbers<[1], [0], [0], [1], [0, 0, 1, 1], [], []>} : vector<64x32xf32>, vector<32x32xf32>, vector<64x32xf32> -> vector<64x32xf32>
    %120 = arith.addf %116, %119 : vector<64x32xf32>
    %121 = vector.extract_strided_slice %87 {offsets = [18, 0], sizes = [64, 32], strides = [1, 1]} : vector<82x32xf32> to vector<64x32xf32>
    %c256_63 = arith.constant 256 : index
    %c0_64 = arith.constant 0 : index
    %122 = vector.load %arg7[%c256_63, %c0_64] : memref<288x32xf32, #tpu.memory_space<vmem>>, vector<32x32xf32>
    %cst_65 = arith.constant dense<0.000000e+00> : vector<64x32xf32>
    %123 = tpu.matmul %121, %122, %cst_65 {dimension_numbers = #tpu.dot_dimension_numbers<[1], [0], [0], [1], [0, 0, 1, 1], [], []>} : vector<64x32xf32>, vector<32x32xf32>, vector<64x32xf32> -> vector<64x32xf32>
    %124 = arith.addf %120, %123 : vector<64x32xf32>
    %c0_66 = arith.constant 0 : index
    %c0_67 = arith.constant 0 : index
    %125 = vector.load %arg8[%c0_66, %c0_67] : memref<1x32xf32, #tpu.memory_space<vmem>>, vector<1x32xf32>
    %126 = vector.broadcast %125 : vector<1x32xf32> to vector<64x32xf32>
    %127 = arith.addf %124, %126 : vector<64x32xf32>
    %c0_68 = arith.constant 0 : index
    %c0_69 = arith.constant 0 : index
    %128 = vector.load %arg9[%c0_68, %c0_69] : memref<1x32xf32, #tpu.memory_space<vmem>>, vector<1x32xf32>
    %c0_70 = arith.constant 0 : index
    %c0_71 = arith.constant 0 : index
    %129 = vector.load %arg10[%c0_70, %c0_71] : memref<1x32xf32, #tpu.memory_space<vmem>>, vector<1x32xf32>
    %cst_72 = arith.constant dense<0.000000e+00> : vector<32xf32>
    %130 = vector.multi_reduction <add>, %127, %cst_72 [0] : vector<64x32xf32> to vector<32xf32>
    %131 = vector.shape_cast %130 : vector<32xf32> to vector<1x32xf32>
    %cst_73 = arith.constant 1.562500e-02 : f32
    %132 = vector.broadcast %cst_73 : f32 to vector<1x32xf32>
    %133 = arith.mulf %131, %132 : vector<1x32xf32>
    %134 = vector.broadcast %133 : vector<1x32xf32> to vector<64x32xf32>
    %135 = arith.subf %127, %134 : vector<64x32xf32>
    %136 = arith.mulf %135, %135 : vector<64x32xf32>
    %cst_74 = arith.constant dense<0.000000e+00> : vector<32xf32>
    %137 = vector.multi_reduction <add>, %136, %cst_74 [0] : vector<64x32xf32> to vector<32xf32>
    %138 = vector.shape_cast %137 : vector<32xf32> to vector<1x32xf32>
    %cst_75 = arith.constant 1.562500e-02 : f32
    %139 = vector.broadcast %cst_75 : f32 to vector<1x32xf32>
    %140 = arith.mulf %138, %139 : vector<1x32xf32>
    %cst_76 = arith.constant 9.99999974E-6 : f32
    %141 = vector.broadcast %cst_76 : f32 to vector<1x32xf32>
    %142 = arith.addf %140, %141 : vector<1x32xf32>
    %143 = math.rsqrt %142 : vector<1x32xf32>
    %144 = vector.broadcast %143 : vector<1x32xf32> to vector<64x32xf32>
    %145 = arith.mulf %135, %144 : vector<64x32xf32>
    %146 = vector.broadcast %128 : vector<1x32xf32> to vector<64x32xf32>
    %147 = arith.mulf %145, %146 : vector<64x32xf32>
    %148 = vector.broadcast %129 : vector<1x32xf32> to vector<64x32xf32>
    %149 = arith.addf %147, %148 : vector<64x32xf32>
    %150 = arith.negf %149 : vector<64x32xf32>
    %151 = math.exp %150 : vector<64x32xf32>
    %cst_77 = arith.constant 1.000000e+00 : f32
    %152 = vector.broadcast %cst_77 : f32 to vector<64x32xf32>
    %153 = arith.addf %152, %151 : vector<64x32xf32>
    %154 = arith.divf %152, %153 : vector<64x32xf32>
    %155 = arith.mulf %149, %154 : vector<64x32xf32>
    %cst_78 = arith.constant 0.000000e+00 : f32
    %156 = vector.broadcast %cst_78 : f32 to vector<9x32xf32>
    %157 = vector.broadcast %2 : vector<64x1xf32> to vector<64x32xf32>
    %158 = arith.mulf %155, %157 : vector<64x32xf32>
    %159 = tpu.concatenate %156, %158, %156 in 0 : vector<9x32xf32>, vector<64x32xf32>, vector<9x32xf32> -> vector<82x32xf32>
    %160 = tpu.concatenate %156, %155, %156 in 0 : vector<9x32xf32>, vector<64x32xf32>, vector<9x32xf32> -> vector<82x32xf32>
    %161 = vector.broadcast %3 : vector<64x1xf32> to vector<64x32xf32>
    %162 = arith.mulf %155, %161 : vector<64x32xf32>
    %163 = tpu.concatenate %156, %162, %156 in 0 : vector<9x32xf32>, vector<64x32xf32>, vector<9x32xf32> -> vector<82x32xf32>
    %cst_79 = arith.constant 0.000000e+00 : f32
    %164 = vector.broadcast %cst_79 : f32 to vector<64x32xf32>
    %165 = vector.extract_strided_slice %159 {offsets = [0, 0], sizes = [64, 32], strides = [1, 1]} : vector<82x32xf32> to vector<64x32xf32>
    %c0_80 = arith.constant 0 : index
    %c0_81 = arith.constant 0 : index
    %166 = vector.load %arg11[%c0_80, %c0_81] : memref<288x32xf32, #tpu.memory_space<vmem>>, vector<32x32xf32>
    %cst_82 = arith.constant dense<0.000000e+00> : vector<64x32xf32>
    %167 = tpu.matmul %165, %166, %cst_82 {dimension_numbers = #tpu.dot_dimension_numbers<[1], [0], [0], [1], [0, 0, 1, 1], [], []>} : vector<64x32xf32>, vector<32x32xf32>, vector<64x32xf32> -> vector<64x32xf32>
    %168 = arith.addf %164, %167 : vector<64x32xf32>
    %169 = vector.extract_strided_slice %160 {offsets = [1, 0], sizes = [64, 32], strides = [1, 1]} : vector<82x32xf32> to vector<64x32xf32>
    %c32_83 = arith.constant 32 : index
    %c0_84 = arith.constant 0 : index
    %170 = vector.load %arg11[%c32_83, %c0_84] : memref<288x32xf32, #tpu.memory_space<vmem>>, vector<32x32xf32>
    %cst_85 = arith.constant dense<0.000000e+00> : vector<64x32xf32>
    %171 = tpu.matmul %169, %170, %cst_85 {dimension_numbers = #tpu.dot_dimension_numbers<[1], [0], [0], [1], [0, 0, 1, 1], [], []>} : vector<64x32xf32>, vector<32x32xf32>, vector<64x32xf32> -> vector<64x32xf32>
    %172 = arith.addf %168, %171 : vector<64x32xf32>
    %173 = vector.extract_strided_slice %163 {offsets = [2, 0], sizes = [64, 32], strides = [1, 1]} : vector<82x32xf32> to vector<64x32xf32>
    %c64_86 = arith.constant 64 : index
    %c0_87 = arith.constant 0 : index
    %174 = vector.load %arg11[%c64_86, %c0_87] : memref<288x32xf32, #tpu.memory_space<vmem>>, vector<32x32xf32>
    %cst_88 = arith.constant dense<0.000000e+00> : vector<64x32xf32>
    %175 = tpu.matmul %173, %174, %cst_88 {dimension_numbers = #tpu.dot_dimension_numbers<[1], [0], [0], [1], [0, 0, 1, 1], [], []>} : vector<64x32xf32>, vector<32x32xf32>, vector<64x32xf32> -> vector<64x32xf32>
    %176 = arith.addf %172, %175 : vector<64x32xf32>
    %177 = vector.extract_strided_slice %159 {offsets = [8, 0], sizes = [64, 32], strides = [1, 1]} : vector<82x32xf32> to vector<64x32xf32>
    %c96_89 = arith.constant 96 : index
    %c0_90 = arith.constant 0 : index
    %178 = vector.load %arg11[%c96_89, %c0_90] : memref<288x32xf32, #tpu.memory_space<vmem>>, vector<32x32xf32>
    %cst_91 = arith.constant dense<0.000000e+00> : vector<64x32xf32>
    %179 = tpu.matmul %177, %178, %cst_91 {dimension_numbers = #tpu.dot_dimension_numbers<[1], [0], [0], [1], [0, 0, 1, 1], [], []>} : vector<64x32xf32>, vector<32x32xf32>, vector<64x32xf32> -> vector<64x32xf32>
    %180 = arith.addf %176, %179 : vector<64x32xf32>
    %181 = vector.extract_strided_slice %160 {offsets = [9, 0], sizes = [64, 32], strides = [1, 1]} : vector<82x32xf32> to vector<64x32xf32>
    %c128_92 = arith.constant 128 : index
    %c0_93 = arith.constant 0 : index
    %182 = vector.load %arg11[%c128_92, %c0_93] : memref<288x32xf32, #tpu.memory_space<vmem>>, vector<32x32xf32>
    %cst_94 = arith.constant dense<0.000000e+00> : vector<64x32xf32>
    %183 = tpu.matmul %181, %182, %cst_94 {dimension_numbers = #tpu.dot_dimension_numbers<[1], [0], [0], [1], [0, 0, 1, 1], [], []>} : vector<64x32xf32>, vector<32x32xf32>, vector<64x32xf32> -> vector<64x32xf32>
    %184 = arith.addf %180, %183 : vector<64x32xf32>
    %185 = vector.extract_strided_slice %163 {offsets = [10, 0], sizes = [64, 32], strides = [1, 1]} : vector<82x32xf32> to vector<64x32xf32>
    %c160_95 = arith.constant 160 : index
    %c0_96 = arith.constant 0 : index
    %186 = vector.load %arg11[%c160_95, %c0_96] : memref<288x32xf32, #tpu.memory_space<vmem>>, vector<32x32xf32>
    %cst_97 = arith.constant dense<0.000000e+00> : vector<64x32xf32>
    %187 = tpu.matmul %185, %186, %cst_97 {dimension_numbers = #tpu.dot_dimension_numbers<[1], [0], [0], [1], [0, 0, 1, 1], [], []>} : vector<64x32xf32>, vector<32x32xf32>, vector<64x32xf32> -> vector<64x32xf32>
    %188 = arith.addf %184, %187 : vector<64x32xf32>
    %189 = vector.extract_strided_slice %159 {offsets = [16, 0], sizes = [64, 32], strides = [1, 1]} : vector<82x32xf32> to vector<64x32xf32>
    %c192_98 = arith.constant 192 : index
    %c0_99 = arith.constant 0 : index
    %190 = vector.load %arg11[%c192_98, %c0_99] : memref<288x32xf32, #tpu.memory_space<vmem>>, vector<32x32xf32>
    %cst_100 = arith.constant dense<0.000000e+00> : vector<64x32xf32>
    %191 = tpu.matmul %189, %190, %cst_100 {dimension_numbers = #tpu.dot_dimension_numbers<[1], [0], [0], [1], [0, 0, 1, 1], [], []>} : vector<64x32xf32>, vector<32x32xf32>, vector<64x32xf32> -> vector<64x32xf32>
    %192 = arith.addf %188, %191 : vector<64x32xf32>
    %193 = vector.extract_strided_slice %160 {offsets = [17, 0], sizes = [64, 32], strides = [1, 1]} : vector<82x32xf32> to vector<64x32xf32>
    %c224_101 = arith.constant 224 : index
    %c0_102 = arith.constant 0 : index
    %194 = vector.load %arg11[%c224_101, %c0_102] : memref<288x32xf32, #tpu.memory_space<vmem>>, vector<32x32xf32>
    %cst_103 = arith.constant dense<0.000000e+00> : vector<64x32xf32>
    %195 = tpu.matmul %193, %194, %cst_103 {dimension_numbers = #tpu.dot_dimension_numbers<[1], [0], [0], [1], [0, 0, 1, 1], [], []>} : vector<64x32xf32>, vector<32x32xf32>, vector<64x32xf32> -> vector<64x32xf32>
    %196 = arith.addf %192, %195 : vector<64x32xf32>
    %197 = vector.extract_strided_slice %163 {offsets = [18, 0], sizes = [64, 32], strides = [1, 1]} : vector<82x32xf32> to vector<64x32xf32>
    %c256_104 = arith.constant 256 : index
    %c0_105 = arith.constant 0 : index
    %198 = vector.load %arg11[%c256_104, %c0_105] : memref<288x32xf32, #tpu.memory_space<vmem>>, vector<32x32xf32>
    %cst_106 = arith.constant dense<0.000000e+00> : vector<64x32xf32>
    %199 = tpu.matmul %197, %198, %cst_106 {dimension_numbers = #tpu.dot_dimension_numbers<[1], [0], [0], [1], [0, 0, 1, 1], [], []>} : vector<64x32xf32>, vector<32x32xf32>, vector<64x32xf32> -> vector<64x32xf32>
    %200 = arith.addf %196, %199 : vector<64x32xf32>
    %c0_107 = arith.constant 0 : index
    %c0_108 = arith.constant 0 : index
    %201 = vector.load %arg12[%c0_107, %c0_108] : memref<1x32xf32, #tpu.memory_space<vmem>>, vector<1x32xf32>
    %202 = vector.broadcast %201 : vector<1x32xf32> to vector<64x32xf32>
    %203 = arith.addf %200, %202 : vector<64x32xf32>
    %204 = arith.addf %203, %51 : vector<64x32xf32>
    %c0_109 = arith.constant 0 : index
    %c0_110 = arith.constant 0 : index
    %c0_111 = arith.constant 0 : index
    %205 = vector.load %arg15[%c0_109, %c0_110, %c0_111] : memref<1x64x32xf32, #tpu.memory_space<vmem>>, vector<1x64x32xf32>
    %206 = vector.shape_cast %205 : vector<1x64x32xf32> to vector<64x32xf32>
    %207 = vector.shape_cast %204 : vector<64x32xf32> to vector<1x64x32xf32>
    tpu.vector_store %arg15[%c0_109, %c0_110, %c0_111], %207 {strides = array<i32>} : memref<1x64x32xf32, #tpu.memory_space<vmem>>, vector<1x64x32xf32>,
    return
  }
  func.func @transform_0(%arg0: i32) -> (i32, i32, i32) {
    %c0_i32 = arith.constant 0 : i32
    %c0_i32_0 = arith.constant 0 : i32
    %c0_i32_1 = arith.constant 0 : i32
    return %arg0, %c0_i32, %c0_i32_0 : i32, i32, i32
  }
  func.func @transform_1(%arg0: i32) -> (i32, i32) {
    %c0_i32 = arith.constant 0 : i32
    %c0_i32_0 = arith.constant 0 : i32
    %c0_i32_1 = arith.constant 0 : i32
    return %c0_i32, %c0_i32_0 : i32, i32
  }
  func.func @transform_2(%arg0: i32) -> (i32, i32) {
    %c0_i32 = arith.constant 0 : i32
    %c0_i32_0 = arith.constant 0 : i32
    %c0_i32_1 = arith.constant 0 : i32
    return %c0_i32, %c0_i32_0 : i32, i32
  }
  func.func @transform_3(%arg0: i32) -> (i32, i32) {
    %c0_i32 = arith.constant 0 : i32
    %c0_i32_0 = arith.constant 0 : i32
    %c0_i32_1 = arith.constant 0 : i32
    return %c0_i32, %c0_i32_0 : i32, i32
  }
  func.func @transform_4(%arg0: i32) -> (i32, i32) {
    %c0_i32 = arith.constant 0 : i32
    %c0_i32_0 = arith.constant 0 : i32
    %c0_i32_1 = arith.constant 0 : i32
    return %c0_i32, %c0_i32_0 : i32, i32
  }
  func.func @transform_5(%arg0: i32) -> (i32, i32) {
    %c0_i32 = arith.constant 0 : i32
    %c0_i32_0 = arith.constant 0 : i32
    %c0_i32_1 = arith.constant 0 : i32
    return %c0_i32, %c0_i32_0 : i32, i32
  }
  func.func @transform_6(%arg0: i32) -> (i32, i32) {
    %c0_i32 = arith.constant 0 : i32
    %c0_i32_0 = arith.constant 0 : i32
    %c0_i32_1 = arith.constant 0 : i32
    return %c0_i32, %c0_i32_0 : i32, i32
  }
  func.func @transform_7(%arg0: i32) -> (i32, i32) {
    %c0_i32 = arith.constant 0 : i32
    %c0_i32_0 = arith.constant 0 : i32
    %c0_i32_1 = arith.constant 0 : i32
    return %c0_i32, %c0_i32_0 : i32, i32
  }
  func.func @transform_8(%arg0: i32) -> (i32, i32) {
    %c0_i32 = arith.constant 0 : i32
    %c0_i32_0 = arith.constant 0 : i32
    %c0_i32_1 = arith.constant 0 : i32
    return %c0_i32, %c0_i32_0 : i32, i32
  }
  func.func @transform_9(%arg0: i32) -> (i32, i32) {
    %c0_i32 = arith.constant 0 : i32
    %c0_i32_0 = arith.constant 0 : i32
    %c0_i32_1 = arith.constant 0 : i32
    return %c0_i32, %c0_i32_0 : i32, i32
  }
  func.func @transform_10(%arg0: i32) -> (i32, i32) {
    %c0_i32 = arith.constant 0 : i32
    %c0_i32_0 = arith.constant 0 : i32
    %c0_i32_1 = arith.constant 0 : i32
    return %c0_i32, %c0_i32_0 : i32, i32
  }
  func.func @transform_11(%arg0: i32) -> (i32, i32) {
    %c0_i32 = arith.constant 0 : i32
    %c0_i32_0 = arith.constant 0 : i32
    %c0_i32_1 = arith.constant 0 : i32
    return %c0_i32, %c0_i32_0 : i32, i32
  }
  func.func @transform_12(%arg0: i32) -> (i32, i32) {
    %c0_i32 = arith.constant 0 : i32
    %c0_i32_0 = arith.constant 0 : i32
    %c0_i32_1 = arith.constant 0 : i32
    return %c0_i32, %c0_i32_0 : i32, i32
  }
  func.func @transform_13(%arg0: i32) -> (i32, i32) {
    %c0_i32 = arith.constant 0 : i32
    %c0_i32_0 = arith.constant 0 : i32
    %c0_i32_1 = arith.constant 0 : i32
    return %c0_i32, %c0_i32_0 : i32, i32
  }
  func.func @transform_14(%arg0: i32) -> (i32, i32, i32) {
    %c0_i32 = arith.constant 0 : i32
    %c0_i32_0 = arith.constant 0 : i32
    %c0_i32_1 = arith.constant 0 : i32
    return %arg0, %c0_i32, %c0_i32_0 : i32, i32, i32
  }
}

</mosaic_0001>

<bundles_post_ra>
// kernel: resnet_forward.1
= control target key start
LH: loop header
LB: loop body
LE: loop exit
PB: predicated region body
PF: predicated region fallthrough
CT: control target
= control target key end

     0   :  { %19 = vsyncpa [#allocation3], 0  ;;  %s8283_s0 = inlined_call_operand.vmem [shape: f32[2,64,32], index: 0, kind: input, shape index: {}]   ;;  %s8284_s1 = inlined_call_operand.vmem [shape: f32[64,2], index: 1, kind: input, shape index: {}]   ;;  %s8285_s2 = inlined_call_operand.vmem [shape: f32[32,32], index: 2, kind: input, shape index: {}, may-alias: {2,3}]   ;;  %s8286_s3 = inlined_call_operand.vmem [shape: f32[32,32], index: 3, kind: input, shape index: {}, may-alias: {2,3}]   ;;  %s8287_s4 = inlined_call_operand.vmem [shape: f32[1,32], index: 4, kind: input, shape index: {}]   ;;  %s8288_s5 = inlined_call_operand.vmem [shape: f32[1,32], index: 5, kind: input, shape index: {}]   ;;  %s8289_s6 = inlined_call_operand.vmem [shape: f32[288,32], index: 6, kind: input, shape index: {}]   ;;  %s8290_s7 = inlined_call_operand.vmem [shape: f32[1,32], index: 7, kind: input, shape index: {}]   ;;  %s8291_s8 = inlined_call_operand.vmem [shape: f32[1,32], index: 8, kind: input, shape index: {}]   ;;  %s8292_s9 = inlined_call_operand.vmem [shape: f32[1,32], index: 9, kind: input, shape index: {}]   ;;  %s8293_s10 = inlined_call_operand.vmem [shape: f32[288,32], index: 10, kind: input, shape index: {}]   ;;  %s8294_s11 = inlined_call_operand.vmem [shape: f32[1,32], index: 11, kind: input, shape index: {}]   ;;  %s8295_s12 = inlined_call_operand.vmem [shape: f32[288,32], index: 12, kind: input, shape index: {}]   ;;  %s8296_s13 = inlined_call_operand.vmem [shape: f32[1,32], index: 13, kind: input, shape index: {}]   ;;  %s8297_s14 = inlined_call_operand.hbm [shape: f32[2,64,32], index: 14, kind: output, shape index: {}]  }
   0x1   :  { %21 = vsyncpa [#allocation3 + $0x1], 0  ;;  %s6533_s27 = smov 0   ;;  %s6535_s28 = smov 0  }
   0x2   :  { %s6537_s29 = smov 0   ;;  %s6539_s30 = smov 0  }
   0x3 LB: > { %8318 = sst [smem:[#allocation5_spill]] %s6446_s29  ;;  %s6554_s15 = sadd.s32 4294967295, %s6450_s30   ;;  %s6450_s30 = sphi %s6539_s30, %s8341_s30   ;;  %s6446_s29 = sphi %s6537_s29, %s8343_s29   ;;  %s6442_s28 = sphi %s6535_s28, %s8345_s28   ;;  %s6438_s27 = sphi %s6533_s27, %s8344_s27  }
   0x4   : > { %s4720_s16 = sadd.s32 4294967294, %s6450_s30   ;;  %s6558_s17 = sadd.s32 1, %s6450_s30  }
   0x5   : > { %8319 = sst [smem:[#allocation6_spill]] %s6558_s17  ;;  %s333_s2 = sadd.s32 1, %s6446_s29 }
   0x6   : > { %s330_s18 = ssub.s32 %s6450_s30, %s6558_s17  ;;  %p343_p0 = scmp.ne.s32.totalorder %s6446_s29, %s6442_s28 }
   0x7   : > { %p331_p1 = scmp.eq.s32.totalorder %s330_s18, 0  ;;  %p344_p2 = scmp.eq.s32.totalorder %s6554_s15, 1 }
   0x8   : > { %p349_p3 = scmp.ne.s32.totalorder %s6442_s28, %s6438_s27  ;;  %p350_p4 = scmp.eq.s32.totalorder %s4720_s16, 1 }
   0x9   : > { %s6569_s3 = scalar_select %p331_p1, %s6446_s29, %s333_s2  }
   0xa   : > { %p6571_p5 = por %p344_p2, %p343_p0  ;;  %p6575_p6 = por %p350_p4, %p349_p3 }
   0xb   : > { %8320 = sst [smem:[#allocation7_spill]] %s6569_s3  ;;  %p4723_p7 = scmp.ge.s32.totalorder %s6450_s30, 1 }
   0xc   : > { %p415_p8 = scmp.lt.s32.totalorder %s6450_s30, 3 }
   0xe   : > { %p416_p9 = pnand %p4723_p7, %p415_p8 }
  0x10   : > { %419 = sbr.rel (%p416_p9) target bundleno = 1053 (0x41d), region = 76 }
  0x17   : > { %v6584_v0 = vld [vmem:[%s8284_s1 + $0x10] sm:$0xff]  ;;  %v6589_v1 = vld [vmem:[%s8284_s1] sm:$0xff]  ;;  %p461_p10 = scmp.lt.s32.totalorder %s6554_s15, 1  ;;  %v6452_v2 = vmov 0   ;;  %v6599_v3 = vld [vmem:[%s8284_s1 + $0x18] sm:$0xff]  ;;  %vm680_vm0 = vcmask 261120  }
  0x18   : > { %6315 = vset.pattern.permute.xlu1 %v6452_v2  ;;  %6314 = vset.pattern.permute.xlu0 %v6452_v2  ;;  %v6604_v4 = vld [vmem:[%s8284_s1 + $0x8] sm:$0xff]  ;;  %v656_v5 = vld [vmem:[%s8295_s12 + $0x20] sm:$0xff]  ;;  %v658_v7 = vld [vmem:[%s8295_s12 + $0x30] sm:$0xff]  ;;  %vm538_vm1 = vcmask 1040384   ;;  %vm662_vm2 = vcmask 1046528   ;;  %v8301_v20 = vmov 0.0  }
  0x19   : > { %494 = vperm.xlu1 %6315, %v6584_v0   ;;  %484 = vperm.xlu0 %6314, %v6589_v1   ;;  %s462_s22 = scalar_select %p461_p10, %s6554_s15, 1  ;;  %v657_v6 = vld [vmem:[%s8295_s12 + $0x28] sm:$0xff]  ;;  %v659_v8 = vld [vmem:[%s8295_s12 + $0x38] sm:$0xff]  ;;  %v652_v10 = vld [vmem:[%s8295_s12] sm:$0xff]  ;;  %v6658_v21 = vrot.slane %v8301_v20, 1  ;;  %v6454_v55 = vmov 1  }
  0x1a   : > { %v5834_v9 = vpack.c.bf16 %v657_v6, %v656_v5  ;;  %v6625_v11 = vld [vmem:[%s8284_s1 + $0x28] sm:$0xff]  ;;  %v6630_v12 = vld [vmem:[%s8284_s1 + $0x20] sm:$0xff]  ;;  %v5838_v13 = vpack.c.bf16 %v659_v8, %v658_v7  ;;  %v654_v15 = vld [vmem:[%s8295_s12 + $0x10] sm:$0xff]  ;;  %vm929_vm3 = vcmask 1045504   ;;  %s6455_s21 = smov [#allocation2]  }
  0x1b   : > { %s4968_s16 = sshll.u32 %s462_s22, 6  ;;  %v653_v14 = vld [vmem:[%s8295_s12 + $0x8] sm:$0xff]  ;;  %v655_v16 = vld [vmem:[%s8295_s12 + $0x18] sm:$0xff]  ;;  %v6695_v41 = vld [vmem:[%s8284_s1 + $0x30] sm:$0xff] }
  0x1c   : > { %s6635_s22 = scalar_lea.vmem %s8283_s0, %s4968_s16  ;;  %5835 = vmatprep.subr.bf16.mxu1 %v5834_v9  ;;  %v5842_v30 = vpack.c.bf16 %v653_v14, %v652_v10  ;;  %v6676_v31 = vpack.c.bf16 %v655_v16, %v654_v15  ;;  %v1195_v60 = vld [vmem:[%s8295_s12 + $0x80] sm:$0xff]  ;;  %v1196_v61 = vld [vmem:[%s8295_s12 + $0x88] sm:$0xff]  ;;  %v1197_v16 = vld [vmem:[%s8295_s12 + $0x90] sm:$0xff]  ;;  %s458_s16 = sand.u32 1, %s6442_s28  }
  0x1d   : > { %499 = vperm.xlu1 %6315, %v6599_v3   ;;  %489 = vperm.xlu0 %6314, %v6604_v4   ;;  %v6649_v17 = vld [vmem:[%s6635_s22] sm:$0xff]  ;;  %v6652_v18 = vld [vmem:[%s6635_s22 + $0x8] sm:$0xff]  ;;  %v6655_v19 = vld [vmem:[%s6635_s22 + $0x10] sm:$0xff]  ;;  %v6744_v15 = vpack.c.bf16 %v1196_v61, %v1195_v60  ;;  %s4724_s23 = sshll.u32 %s458_s16, 6 }
  0x1e   : > { %v6661_v22 = vld [vmem:[%s6635_s22 + $0x18] sm:$0xff]  ;;  %v6664_v23 = vld [vmem:[%s6635_s22 + $0x20] sm:$0xff]  ;;  %v6667_v24 = vld [vmem:[%s6635_s22 + $0x28] sm:$0xff]  ;;  %v566_v25 = vrot.slane %v6649_v17, 7  ;;  %v1816_v26 = vsel %vm680_vm0, %v6649_v17, 0.0  ;;  %v1817_v27 = vsel %vm680_vm0, %v6652_v18, 0.0  ;;  %5837 = vmatpush3.bf16.msra.mxu1 %v5834_v9 }
  0x1f   : > { %v1818_v28 = vadd.f32 %v1817_v27, %v1816_v26  ;;  %v1819_v29 = vsel %vm680_vm0, %v6655_v19, 0.0  ;;  %5839 = vmatprep.subr.bf16.mxu1 %v5838_v13  ;;  %v1821_v33 = vsel %vm680_vm0, %v6661_v22, 0.0  ;;  %v1823_v34 = vsel %vm680_vm0, %v6664_v23, 0.0  ;;  %v6688_v36 = vld [vmem:[%s6635_s22 + $0x30] sm:$0xff]  ;;  %v6706_v50 = vld [vmem:[%s6635_s22 + $0x38] sm:$0xff]  ;;  %v924_v7 = vld [vmem:[%s8295_s12 + $0x40] sm:$0xff]  ;;  %5867 = vmatprep.subr.bf16.mxu0 %v6744_v15 }
  0x20   : > { %v583_v32 = vsel %vm538_vm1, 0.0, %v566_v25  ;;  %v1825_v35 = vsel %vm680_vm0, %v6667_v24, 0.0  ;;  %v567_v39 = vrot.slane %v6652_v18, 7  ;;  %v569_v40 = vrot.slane %v6655_v19, 7  ;;  %v925_v8 = vld [vmem:[%s8295_s12 + $0x48] sm:$0xff]  ;;  %5869 = vmatpush3.bf16.msra.mxu0 %v6744_v15  ;;  %s8209_s3 = scalar_lea.vmem [#allocation2], %s4724_s23 }
  0x21   : > { %509 = vperm.xlu1 %6315, %v6625_v11   ;;  %504 = vperm.xlu0 %6314, %v6630_v12   ;;  %v664_v37 = vrot.slane %v583_v32, 1  ;;  %v1820_v38 = vadd.f32 %v1819_v29, %v1818_v28  ;;  %v571_v42 = vrot.slane %v6661_v22, 7  ;;  %v573_v43 = vrot.slane %v6664_v23, 7  ;;  %s4969_s22 = sshll.u32 %s6554_s15, 10  ;;  %s4658_s25 = sshll.u32 %s8209_s3, 4  ;;  %s8234_s25 = int_to_ptr.vmem [resolvable:$true] %s4658_s25 }
  0x22   : > { %v575_v44 = vrot.slane %v6667_v24, 7  ;;  %v577_v45 = vrot.slane %v6688_v36, 7  ;;  %5841 = vmatpush3.bf16.msra.mxu1 %v5838_v13  ;;  %v568_v48 = vsel %vm538_vm1, %v566_v25, %v567_v39  ;;  %v570_v49 = vsel %vm538_vm1, %v567_v39, %v569_v40  ;;  %v1198_v25 = vld [vmem:[%s8295_s12 + $0x98] sm:$0xff]  ;;  %s8232_s2 = scalar_lea.hbm %s8297_s14, %s4969_s22  ;;  %s8242_s15 = scalar_lea.sflag [#allocation3], %s458_s16 }
  0x23   : > { %v665_v46 = vsel %vm662_vm2, %v6658_v21, %v664_v37  ;;  %v1822_v47 = vadd.f32 %v1821_v33, %v1820_v38  ;;  %v666_v51 = vrot.slane %v568_v48, 1  ;;  %v668_v52 = vrot.slane %v570_v49, 1  ;;  %5843 = vmatprep.subr.bf16.mxu1 %v5842_v30  ;;  %s6388_s18 = scalar_lea.vmem %s8234_s25, 1024  ;;  %s6392_s23 = sshll.u32 %s6455_s21, 4  ;;  %s6393_s23 = int_to_ptr.vmem [resolvable:$false] %s6392_s23 }
  0x24   : > { %5302 = vmatprep.mubr.msk.f32.mxu1 %vm680_vm0, %v665_v46  ;;  %v572_v53 = vsel %vm538_vm1, %v569_v40, %v571_v42  ;;  %v574_v54 = vsel %vm538_vm1, %v571_v42, %v573_v43  ;;  %v576_v59 = vsel %vm538_vm1, %v573_v43, %v575_v44  ;;  %v1827_v62 = vsel %vm680_vm0, %v6688_v36, 0.0  ;;  %v481_v43 = vld [vmem:[%s8284_s1 + $0x38] sm:$0xff]  ;;  %p6389_p11 = scmp.ne.s32.totalorder %s8234_s25, %s6388_s18  ;;  %s6394_s24 = scalar_lea.vmem %s6393_s23, 2048 }
  0x25   : > { %6316 = vset.pattern.permute.xlu1 %v6454_v55  ;;  %514 = vperm.xlu0 %6314, %v6695_v41   ;;  %v1824_v56 = vadd.f32 %v1823_v34, %v1822_v47  ;;  %v670_v57 = vrot.slane %v572_v53, 1  ;;  %v672_v58 = vrot.slane %v574_v54, 1  ;;  %v667_v63 = vsel %vm662_vm2, %v664_v37, %v666_v51  ;;  %v1317_v34 = vld [vmem:[%s8295_s12 + $0xa0] sm:$0xff]  ;;  %p6395_p0 = scmp.lt.s32.totalorder %s8234_s25, %s6393_s23  ;;  %p6396_p1 = scmp.lt.s32.totalorder %s6394_s24, %s6388_s18 }
  0x26   : > { %586 = vperm.xlu1 %6316, %v6589_v1   ;;  %v6725_v5 = vsel %vm662_vm2, %v666_v51, %v668_v52  ;;  %v578_v6 = vsel %vm538_vm1, %v575_v44, %v577_v45  ;;  %v1829_v1 = vsel %vm680_vm0, %v6706_v50, 0.0  ;;  %5303 = vmatmul.mubr.msk.f32.vlgmr.msra.gmra.mrb[0].mxu1 %vm680_vm0, %v667_v63  ;;  %v674_v13 = vrot.slane %v576_v59, 1  ;;  %v1440_v59 = vld [vmem:[%s8295_s12 + $0xc8] sm:$0xff]  ;;  %p6390_p12 = pnand %p6389_p11, %p6571_p5 }
  0x27   : > { %v1826_v9 = vadd.f32 %v1825_v35, %v1824_v56  ;;  %5382 = vmatprep.mubr.msk.f32.mxu0 %vm680_vm0, %v667_v63  ;;  %5305 = vmatprep.mubr.msk.f32.mxu1 %vm680_vm0, %v6725_v5  ;;  %v6741_v10 = vsel %vm662_vm2, %v668_v52, %v670_v57  ;;  %v579_v14 = vrot.slane %v6706_v50, 7  ;;  %v6754_v27 = vsel %vm662_vm2, %v670_v57, %v672_v58  ;;  %v1318_v35 = vld [vmem:[%s8295_s12 + $0xa8] sm:$0xff]  ;;  %p6397_p2 = por %p6396_p1, %p6395_p0 }
  0x28   : > { %5845 = vmatpush3.bf16.msra.mxu1 %v5842_v30  ;;  %v676_v28 = vrot.slane %v578_v6, 1  ;;  %v6757_v29 = vpack.c.bf16 %v925_v8, %v924_v7  ;;  %v6769_v33 = vpack.c.bf16 %v1198_v25, %v1197_v16  ;;  %v5874_v39 = vpack.c.bf16 %v1318_v35, %v1317_v34  ;;  %p6391_p13 = pneg %p6390_p12 }
  0x29   : > { %6317 = vset.pattern.permute.xlu0 %v6454_v55  ;;  %v1828_v26 = vadd.f32 %v1827_v62, %v1826_v9  ;;  %5847 = vmatprep.subr.bf16.mxu1 %v6676_v31  ;;  %v6764_v30 = vsel %vm538_vm1, %v577_v45, %v579_v14 }
  0x2a   : > { %594 = vperm.xlu1 %6316, %v6584_v0   ;;  %590 = vperm.xlu0 %6317, %v6604_v4   ;;  %v6774_v0 = vsel %vm662_vm2, %v672_v58, %v674_v13  ;;  %v678_v4 = vrot.slane %v6764_v30, 1  ;;  %v6785_v38 = vsel %vm662_vm2, %v674_v13, %v676_v28  ;;  %v1439_v58 = vld [vmem:[%s8295_s12 + $0xc0] sm:$0xff]  ;;  %p6398_p3 = pnand %p6397_p2, %p6391_p13 }
  0x2b   : > { %v1830_v32 = vadd.f32 %v1829_v1, %v1828_v26  ;;  %5306 = vmatmul.mubr.msk.f32.gmra.mrb[2].mxu1 %vm680_vm0, %v6741_v10  ;;  %5871 = vmatprep.subr.bf16.mxu0 %v6769_v33  ;;  %v6866_v1 = vpack.c.bf16 %v1440_v59, %v1439_v58  ;;  %v6893_v59 = vld [vmem:[%s8287_s4] ss:$0 sm:$0xff] }
  0x2c   : > { %5308 = vmatprep.mubr.msk.f32.mxu1 %vm680_vm0, %v6754_v27  ;;  %5849 = vmatpush3.bf16.msra.mxu1 %v6676_v31  ;;  %v6799_v40 = vsel %vm662_vm2, %v676_v28, %v678_v4 }
  0x2d   : > { %v1831_v37 = vrot.slane %v1830_v32, 4  ;;  %5851 = vmatprep.subr.bf16.mxu1 %v6757_v29  ;;  %5873 = vmatpush3.bf16.msra.mxu0 %v6769_v33 }
  0x2e   : > { %598 = vperm.xlu1 %6316, %v6599_v3   ;;  %602 = vperm.xlu0 %6317, %v6630_v12   ;;  %v1319_v3 = vld [vmem:[%s8295_s12 + $0xb0] sm:$0xff]  ;;  %v1320_v12 = vld [vmem:[%s8295_s12 + $0xb8] sm:$0xff] }
  0x2f   : > { %v1832_v31 = vadd.f32 %v1831_v37, %v1830_v32  ;;  %5309 = vmatmul.mubr.msk.f32.gmra.mrb[4].mxu1 %vm680_vm0, %v6774_v0  ;;  %5875 = vmatprep.subr.bf16.mxu0 %v5874_v39  ;;  %v5878_v45 = vpack.c.bf16 %v1320_v12, %v1319_v3 }
  0x30   : > { %5311 = vmatprep.mubr.msk.f32.mxu1 %vm680_vm0, %v6785_v38  ;;  %5383 = vmatmul.mubr.msk.f32.vlgmr.msra.gmra.mrb[0].mxu0 %vm680_vm0, %v6725_v5 }
  0x31   : > { %v1833_v42 = vrot.slane %v1832_v31, 2  ;;  %5877 = vmatpush3.bf16.msra.mxu0 %v5874_v39  ;;  %5385 = vmatprep.mubr.msk.f32.mxu0 %vm680_vm0, %v6741_v10 }
  0x32   : > { %606 = vperm.xlu1 %6316, %v6625_v11   ;;  %610 = vperm.xlu0 %6317, %v6695_v41  }
  0x33   : > { %v1834_v44 = vadd.f32 %v1833_v42, %v1832_v31  ;;  %5312 = vmatmul.mubr.msk.f32.gmra.mrb[6].mxu1 %vm680_vm0, %v6799_v40  ;;  %5879 = vmatprep.subr.bf16.mxu0 %v5878_v45 }
  0x34   : > { %5322 = vmatprep.mubr.f32.mxu1 %v8301_v20  ;;  %5386 = vmatmul.mubr.msk.f32.gmra.mrb[2].mxu0 %vm680_vm0, %v6754_v27 }
  0x35   : > { %v1835_v46 = vrot.slane %v1834_v44, 1  ;;  %5881 = vmatpush3.bf16.msra.mxu0 %v5878_v45  ;;  %v6876_v45 = vsel %vm538_vm1, %v579_v14, 0.0 }
  0x36   : > { %614 = vperm.xlu1 %6316, %v481_v43   ;;  %6318 = vset.pattern.permute.xlu0 %v6452_v2 }
  0x37   : > { %519 = vperm.xlu0 %6318, %v481_v43   ;;  %v1836_v11 = vadd.f32 %v1835_v46, %v1834_v44  ;;  %5883 = vmatprep.subr.bf16.mxu0 %v6866_v1 }
  0x39   : > { %v1837_v41 = vmul.f32 0.015625, %v1836_v11  ;;  %v8303_v11 = vrot.slane %v6876_v45, 1 }
  0x3b   : > { %v6824_v47 = vsub.f32 %v6649_v17, %v1837_v41  ;;  %v6827_v48 = vsub.f32 %v6652_v18, %v1837_v41  ;;  %v6830_v49 = vsub.f32 %v6655_v19, %v1837_v41  ;;  %v6833_v51 = vsub.f32 %v6661_v22, %v1837_v41  ;;  %6319 = vset.pattern.permute.xlu0 %v6454_v55 }
  0x3c   : > { %v6837_v2 = vsub.f32 %v6664_v23, %v1837_v41  ;;  %v6840_v52 = vsub.f32 %v6667_v24, %v1837_v41  ;;  %v1844_v55 = vsub.f32 %v6688_v36, %v1837_v41  ;;  %v1845_v7 = vsub.f32 %v6706_v50, %v1837_v41 }
  0x3d   : > { %v1846_v53 = vmul.f32 %v6824_v47, %v6824_v47  ;;  %v1847_v54 = vmul.f32 %v6827_v48, %v6827_v48  ;;  %v1848_v56 = vmul.f32 %v6830_v49, %v6830_v49  ;;  %v1849_v57 = vmul.f32 %v6833_v51, %v6833_v51 }
  0x3e   : > { %v1850_v61 = vmul.f32 %v6837_v2, %v6837_v2  ;;  %v1851_v8 = vmul.f32 %v6840_v52, %v6840_v52  ;;  %v1852_v16 = vmul.f32 %v1844_v55, %v1844_v55  ;;  %v1853_v28 = vmul.f32 %v1845_v7, %v1845_v7 }
  0x3f   : > { %v1854_v60 = vsel %vm680_vm0, %v1846_v53, 0.0  ;;  %v1855_v62 = vsel %vm680_vm0, %v1847_v54, 0.0  ;;  %v1857_v63 = vsel %vm680_vm0, %v1848_v56, 0.0  ;;  %v1859_v9 = vsel %vm680_vm0, %v1849_v57, 0.0 }
  0x40   : > { %v1856_v6 = vadd.f32 %v1855_v62, %v1854_v60  ;;  %v1861_v25 = vsel %vm680_vm0, %v1850_v61, 0.0  ;;  %v1863_v32 = vsel %vm680_vm0, %v1851_v8, 0.0  ;;  %v1865_v35 = vsel %vm680_vm0, %v1852_v16, 0.0  ;;  %v6900_v60 = vld [vmem:[%s8288_s5] ss:$0 sm:$0xff] }
  0x41   : > { %v1867_v31 = vsel %vm680_vm0, %v1853_v28, 0.0  ;;  %v6884_v41 = vsel %vm662_vm2, %v678_v4, %v8303_v11  ;;  %v927_v28 = vld [vmem:[%s8295_s12 + $0x58] sm:$0xff] }
  0x42   : > { %v1858_v13 = vadd.f32 %v1857_v63, %v1856_v6 }
  0x44   : > { %v1860_v26 = vadd.f32 %v1859_v9, %v1858_v13 }
  0x46   : > { %v1862_v34 = vadd.f32 %v1861_v25, %v1860_v26  ;;  %v926_v26 = vld [vmem:[%s8295_s12 + $0x50] sm:$0xff] }
  0x48   : > { %v1864_v37 = vadd.f32 %v1863_v32, %v1862_v34 }
  0x4a   : > { %v1866_v39 = vadd.f32 %v1865_v35, %v1864_v37 }
  0x4c   : > { %v1868_v3 = vadd.f32 %v1867_v31, %v1866_v39  ;;  %v5854_v39 = vpack.c.bf16 %v927_v28, %v926_v26 }
  0x4e   : > { %v1869_v12 = vrot.slane %v1868_v3, 4 }
  0x50   : > { %v1870_v42 = vadd.f32 %v1869_v12, %v1868_v3  ;;  %v1076_v3 = vld [vmem:[%s8295_s12 + $0x60] sm:$0xff]  ;;  %v1077_v12 = vld [vmem:[%s8295_s12 + $0x68] sm:$0xff] }
  0x52   : > { %v1871_v43 = vrot.slane %v1870_v42, 2 }
  0x54   : > { %v1872_v44 = vadd.f32 %v1871_v43, %v1870_v42 }
  0x56   : > { %v1873_v46 = vrot.slane %v1872_v44, 1 }
  0x58   : > { %v1874_v53 = vadd.f32 %v1873_v46, %v1872_v44 }
  0x5a   : > { %v1875_v54 = vmul.f32 0.015625, %v1874_v53 }
  0x5c   : > { %v1876_v56 = vadd.f32 1e-05, %v1875_v54 }
  0x5e   : > { %6320 = vrsqrt.f32 %v1876_v56 }
  0x68   : > { %v6886_v57 = vpop.eup %6320 }
  0x69   : > { %v1884_v58 = vmul.f32 %v6886_v57, %v1844_v55  ;;  %v1885_v14 = vmul.f32 %v6886_v57, %v1845_v7  ;;  %v1878_v35 = vmul.f32 %v6886_v57, %v6824_v47  ;;  %v1880_v46 = vmul.f32 %v6886_v57, %v6830_v49 }
  0x6a   : > { %v1881_v54 = vmul.f32 %v6886_v57, %v6833_v51  ;;  %v1879_v56 = vmul.f32 %v6886_v57, %v6827_v48 }
  0x6b   : > { %v1898_v30 = vmul.f32 %v6893_v59, %v1884_v58  ;;  %v1899_v4 = vmul.f32 %v6893_v59, %v1885_v14  ;;  %v6946_v58 = vpack.c.bf16 %v1077_v12, %v1076_v3  ;;  %v1883_v3 = vmul.f32 %v6886_v57, %v6840_v52 }
  0x6c   : > { %v1893_v26 = vmul.f32 %v6893_v59, %v1879_v56 }
  0x6d   : > { %v1912_v61 = vadd.f32 %v6900_v60, %v1898_v30  ;;  %v1913_v55 = vadd.f32 %v6900_v60, %v1899_v4  ;;  %v1892_v30 = vmul.f32 %v6893_v59, %v1878_v35 }
  0x6f   : > { %v4807_v62 = vmul.f32 -1.442695, %v1912_v61  ;;  %v4808_v63 = vmul.f32 -1.442695, %v1913_v55 }
  0x71   : > { %6322 = vpow2.f32 %v4807_v62 }
  0x72   : > { %6324 = vpow2.f32 %v4808_v63 }
  0x7b   : > { %v6323_v6 = vpop.eup %6322 }
  0x7c   : > { %v6325_v7 = vpop.eup %6324  ;;  %v1944_v8 = vadd.f32 1.0, %v6323_v6 }
  0x7d   : > { %v1945_v9 = vadd.f32 1.0, %v6325_v7  ;;  %v1894_v7 = vmul.f32 %v6893_v59, %v1880_v46 }
  0x7e   : > { %6326 = vrcp.f32 %v1944_v8  ;;  %v1882_v8 = vmul.f32 %v6886_v57, %v6837_v2  ;;  %v7007_v57 = vadd.f32 %v6900_v60, %v1893_v26 }
  0x7f   : > { %6328 = vrcp.f32 %v1945_v9 }
  0x80   : > { %v1896_v46 = vmul.f32 %v6893_v59, %v1882_v8  ;;  %v7038_v8 = vrot.slane %v8301_v20, 2 }
  0x82   : > { %8325 = vst [vmem:[#allocation10_spill] sm:$0xff] %v7038_v8 }
  0x88   : > { %v6327_v42 = vpop.eup %6326 }
  0x89   : > { %v6329_v44 = vpop.eup %6328  ;;  %v6957_v6 = vmul.f32 %v6327_v42, %v1912_v61 }
  0x8b   : > { %v8304_v61 = vrot.slane %v6957_v6, 7 }
  0x98   : > { %v6904_v13 = vpop.permute.xlu1 %494  ;;  %v6906_v16 = vpop.permute.xlu0 %484 }
  0x99   : > { %v522_v25 = vmul.f32 %v6906_v16, %v6649_v17  ;;  %v524_v34 = vmul.f32 %v6904_v13, %v6655_v19 }
  0x9b   : > { %v539_v32 = vrot.slane %v522_v25, 7  ;;  %v542_v14 = vrot.slane %v524_v34, 7  ;;  %v6976_v34 = vadd.f32 %v6900_v60, %v1892_v30 }
  0x9c   : > { %v6920_v37 = vpop.permute.xlu1 %499  ;;  %v6922_v31 = vpop.permute.xlu0 %489 }
  0x9d   : > { %v6931_v43 = vsel %vm538_vm1, 0.0, %v539_v32  ;;  %v525_v47 = vmul.f32 %v6920_v37, %v6661_v22  ;;  %v523_v53 = vmul.f32 %v6922_v31, %v6652_v18 }
  0x9e   : > { %5323 = vmatmul.mubr.msk.f32.vlgmr.msra.gmra.mrb[0].mxu1 %vm680_vm0, %v6931_v43 }
  0x9f   : > { %5853 = vmatpush3.bf16.msra.mxu1 %v6757_v29  ;;  %v544_v49 = vrot.slane %v525_v47, 7  ;;  %v540_v4 = vrot.slane %v523_v53, 7  ;;  %v6959_v29 = vmul.f32 %v6329_v44, %v1913_v55  ;;  %v7000_v47 = vadd.f32 %v6900_v60, %v1894_v7 }
  0xa0   : > { %v6949_v62 = vpop.permute.xlu1 %509  ;;  %v6951_v63 = vpop.permute.xlu0 %504  ;;  %5855 = vmatprep.subr.bf16.mxu1 %v5854_v39  ;;  %v1895_v44 = vmul.f32 %v6893_v59, %v1881_v54  ;;  %v4801_v54 = vmul.f32 -1.442695, %v6976_v34 }
  0xa1   : > { %v527_v51 = vmul.f32 %v6949_v62, %v6667_v24  ;;  %v526_v48 = vmul.f32 %v6951_v63, %v6664_v23  ;;  %8323 = vst [vmem:[#allocation8_spill] sm:$0xff] %v6959_v29  ;;  %v6965_v9 = vsel %vm538_vm1, %v539_v32, %v540_v4  ;;  %v6968_v25 = vsel %vm538_vm1, %v540_v4, %v542_v14 }
  0xa2   : > { %5325 = vmatprep.mubr.msk.f32.mxu1 %vm680_vm0, %v6965_v9  ;;  %v2026_v55 = vrot.slane %v6959_v29, 7  ;;  %v6983_v35 = vsel %vm538_vm1, %v542_v14, %v544_v49  ;;  %v1897_v4 = vmul.f32 %v6893_v59, %v1883_v3  ;;  %v7041_v26 = vadd.f32 %v6900_v60, %v1895_v44 }
  0xa3   : > { %v546_v28 = vrot.slane %v526_v48, 7  ;;  %5857 = vmatpush3.bf16.msra.mxu1 %v5854_v39  ;;  %v548_v2 = vrot.slane %v527_v51, 7  ;;  %v4802_v3 = vmul.f32 -1.442695, %v7007_v57  ;;  %v4803_v11 = vmul.f32 -1.442695, %v7000_v47 }
  0xa4   : > { %5326 = vmatmul.mubr.msk.f32.gmra.mrb[2].mxu1 %vm680_vm0, %v6968_v25  ;;  %v6980_v32 = vpop.permute.xlu0 %514  ;;  %5859 = vmatprep.subr.bf16.mxu1 %v6946_v58  ;;  %v7013_v56 = vsel %vm538_vm1, %v8304_v61, %v2026_v55  ;;  %v7016_v14 = vsel %vm538_vm1, %v2026_v55, 0.0  ;;  %6330 = vpow2.f32 %v4801_v54  ;;  %v4804_v54 = vmul.f32 -1.442695, %v7041_v26 }
  0xa5   : > { %v6990_v39 = vmul.f32 %v6980_v32, %v6688_v36  ;;  %5328 = vmatprep.mubr.msk.f32.mxu1 %vm680_vm0, %v6983_v35  ;;  %v6994_v12 = vpop.permute.xlu1 %586  ;;  %v6997_v42 = vsel %vm538_vm1, %v544_v49, %v546_v28  ;;  %8324 = vst [vmem:[#allocation9_spill] sm:$0xff] %v7016_v14  ;;  %v8306_v49 = vrot.slane %v7016_v14, 1  ;;  %v8307_v55 = vrot.slane %v7013_v56, 1 }
  0xa6   : > { %v617_v52 = vmul.f32 %v6994_v12, %v6649_v17  ;;  %v7022_v17 = vsel %vm538_vm1, %v546_v28, %v548_v2  ;;  %6332 = vpow2.f32 %v4802_v3 }
  0xa7   : > { %v8305_v53 = vrot.slane %v6990_v39, 7  ;;  %6334 = vpow2.f32 %v4803_v11 }
  0xa8   : > { %v633_v30 = vrot.slane %v617_v52, 7  ;;  %5329 = vmatmul.mubr.msk.f32.gmra.mrb[4].mxu1 %vm680_vm0, %v6997_v42  ;;  %v7049_v52 = vadd.f32 %v6900_v60, %v1896_v46  ;;  %6336 = vpow2.f32 %v4804_v54 }
  0xa9   : > { %5331 = vmatprep.mubr.msk.f32.mxu1 %vm680_vm0, %v7022_v17  ;;  %v7028_v51 = vpop.permute.xlu1 %594  ;;  %v7030_v48 = vpop.permute.xlu0 %590  ;;  %v7035_v7 = vsel %vm538_vm1, %v548_v2, %v8305_v53 }
  0xaa   : > { %v650_v59 = vsel %vm538_vm1, 0.0, %v633_v30  ;;  %v619_v28 = vmul.f32 %v7028_v51, %v6655_v19  ;;  %v618_v20 = vmul.f32 %v7030_v48, %v6652_v18  ;;  %v7061_v19 = vsel %vm662_vm2, %v8307_v55, %v8306_v49  ;;  %v1079_v55 = vld [vmem:[%s8295_s12 + $0x78] sm:$0xff] }
  0xab   : > { %v931_v2 = vrot.slane %v650_v59, 2  ;;  %8326 = vst [vmem:[#allocation11_spill] sm:$0xff] %v7061_v19 }
  0xac   : > { %v636_v44 = vrot.slane %v619_v28, 7  ;;  %5332 = vmatmul.mubr.msk.f32.gmra.mrb[6].mxu1 %vm680_vm0, %v7035_v7  ;;  %v634_v46 = vrot.slane %v618_v20, 7  ;;  %v7071_v28 = vadd.f32 %v6900_v60, %v1897_v4  ;;  %v1078_v20 = vld [vmem:[%s8295_s12 + $0x70] sm:$0xff] }
  0xad   : > { %v7063_v61 = vpop.permute.xlu1 %598  ;;  %v7065_v59 = vpop.permute.xlu0 %602  ;;  %v932_v18 = vsel %vm929_vm3, %v7038_v8, %v931_v2 }
  0xae   : > { %8327 = vst [vmem:[#allocation12_spill] sm:$0xff] %v7063_v61  ;;  %8328 = vst [vmem:[#allocation13_spill] sm:$0xff] %v7065_v59  ;;  %v620_v53 = vmul.f32 %v7063_v61, %v6661_v22  ;;  %v621_v49 = vmul.f32 %v7065_v59, %v6664_v23  ;;  %5342 = vmatprep.mubr.msk.f32.mxu1 %vm680_vm0, %v932_v18  ;;  %v635_v60 = vsel %vm538_vm1, %v633_v30, %v634_v46 }
  0xaf   : > { %v637_v4 = vsel %vm538_vm1, %v634_v46, %v636_v44  ;;  %v4805_v22 = vmul.f32 -1.442695, %v7049_v52  ;;  %v933_v14 = vrot.slane %v635_v60, 2  ;;  %v5862_v59 = vpack.c.bf16 %v1079_v55, %v1078_v20  ;;  %v1441_v55 = vld [vmem:[%s8295_s12 + $0xd0] sm:$0xff]  ;;  %v1559_v20 = vld [vmem:[%s8295_s12 + $0xe0] sm:$0xff]  ;;  %v1560_v60 = vld [vmem:[%s8295_s12 + $0xe8] sm:$0xff] }
  0xb0   : > { %v638_v23 = vrot.slane %v620_v53, 7  ;;  %v640_v19 = vrot.slane %v621_v49, 7  ;;  %v935_v8 = vrot.slane %v637_v4, 2  ;;  %v4806_v61 = vmul.f32 -1.442695, %v7071_v28  ;;  %v6331_v4 = vpop.eup %6330 }
  0xb1   : > { %v7087_v18 = vpop.permute.xlu1 %606  ;;  %v7089_v29 = vpop.permute.xlu0 %610  ;;  %v934_v3 = vsel %vm929_vm3, %v931_v2, %v933_v14  ;;  %6338 = vpow2.f32 %v4805_v22 }
  0xb2   : > { %v622_v30 = vmul.f32 %v7087_v18, %v6667_v24  ;;  %v623_v11 = vmul.f32 %v7089_v29, %v6688_v36  ;;  %v7098_v53 = vsel %vm929_vm3, %v933_v14, %v935_v8  ;;  %v639_v49 = vsel %vm538_vm1, %v636_v44, %v638_v23  ;;  %v1442_v24 = vld [vmem:[%s8295_s12 + $0xd8] sm:$0xff]  ;;  %5343 = vmatmul.mubr.msk.f32.vlgmr.msra.gmra.mrb[0].mxu1 %vm680_vm0, %v934_v3 }
  0xb3   : > { %v641_v46 = vsel %vm538_vm1, %v638_v23, %v640_v19  ;;  %5402 = vmatprep.mubr.msk.f32.mxu0 %vm680_vm0, %v934_v3  ;;  %5861 = vmatpush3.bf16.msra.mxu1 %v6946_v58  ;;  %v937_v2 = vrot.slane %v639_v49, 2  ;;  %v5886_v23 = vpack.c.bf16 %v1442_v24, %v1441_v55  ;;  %6340 = vpow2.f32 %v4806_v61  ;;  %v6333_v61 = vpop.eup %6332 }
  0xb4   : > { %v642_v54 = vrot.slane %v622_v30, 7  ;;  %v644_v36 = vrot.slane %v623_v11, 7  ;;  %5345 = vmatprep.mubr.msk.f32.mxu1 %vm680_vm0, %v7098_v53  ;;  %v939_v44 = vrot.slane %v641_v46, 2  ;;  %5403 = vmatmul.mubr.msk.f32.vlgmr.msra.gmra.mrb[0].mxu0 %vm680_vm0, %v7098_v53  ;;  %v5890_v46 = vpack.c.bf16 %v1560_v60, %v1559_v20  ;;  %v6335_v24 = vpop.eup %6334 }
  0xb5   : > { %v7113_v14 = vpop.permute.xlu1 %614  ;;  %5863 = vmatprep.subr.bf16.mxu1 %v5862_v59  ;;  %v7127_v30 = vsel %vm929_vm3, %v935_v8, %v937_v2  ;;  %5885 = vmatpush3.bf16.msra.mxu0 %v6866_v1  ;;  %v1938_v55 = vadd.f32 1.0, %v6331_v4  ;;  %v6337_v20 = vpop.eup %6336  ;;  %v1939_v60 = vadd.f32 1.0, %v6333_v61  ;;  %v1940_v4 = vadd.f32 1.0, %v6335_v24  ;;  %v1561_v61 = vld [vmem:[%s8295_s12 + $0xf0] sm:$0xff] }
  0xb6   : > { %v624_v58 = vmul.f32 %v7113_v14, %v6706_v50  ;;  %v643_v22 = vsel %vm538_vm1, %v640_v19, %v642_v54  ;;  %v7130_v11 = vsel %vm929_vm3, %v937_v2, %v939_v44  ;;  %5346 = vmatmul.mubr.msk.f32.gmra.mrb[2].mxu1 %vm680_vm0, %v7127_v30  ;;  %5405 = vmatprep.mubr.msk.f32.mxu0 %vm680_vm0, %v7127_v30  ;;  %v7186_v24 = vpop.permute.xlu0 %519 }
  0xb7   : > { %v941_v49 = vrot.slane %v643_v22, 2  ;;  %v645_v19 = vsel %vm538_vm1, %v642_v54, %v644_v36  ;;  %5348 = vmatprep.mubr.msk.f32.mxu1 %vm680_vm0, %v7130_v11  ;;  %5865 = vmatpush3.bf16.msra.mxu1 %v5862_v59  ;;  %6342 = vrcp.f32 %v1938_v55  ;;  %v1562_v55 = vld [vmem:[%s8295_s12 + $0xf8] sm:$0xff] }
  0xb8   : > { %v646_v3 = vrot.slane %v624_v58, 7  ;;  %v943_v8 = vrot.slane %v645_v19, 2  ;;  %5406 = vmatmul.mubr.msk.f32.gmra.mrb[2].mxu0 %vm680_vm0, %v7130_v11  ;;  %5887 = vmatprep.subr.bf16.mxu0 %v5886_v23  ;;  %6344 = vrcp.f32 %v1939_v60  ;;  %v1680_v60 = vld [vmem:[%s8295_s12 + $0x108] sm:$0xff] }
  0xb9   : > { %5889 = vmatpush3.bf16.msra.mxu0 %v5886_v23  ;;  %6050 = vmatprep.subr.bf16.mxu1 %v6744_v15  ;;  %v7149_v59 = vsel %vm929_vm3, %v939_v44, %v941_v49  ;;  %6346 = vrcp.f32 %v1940_v4 }
  0xba   : > { %v647_v1 = vsel %vm538_vm1, %v644_v36, %v646_v3  ;;  %v7142_v2 = vsel %vm538_vm1, %v646_v3, 0.0  ;;  %v7152_v36 = vsel %vm929_vm3, %v941_v49, %v943_v8  ;;  %5891 = vmatprep.subr.bf16.mxu0 %v5890_v46  ;;  %5349 = vmatmul.mubr.msk.f32.gmra.mrb[4].mxu1 %vm680_vm0, %v7149_v59  ;;  %v1941_v3 = vadd.f32 1.0, %v6337_v20  ;;  %v1679_v20 = vld [vmem:[%s8295_s12 + $0x100] sm:$0xff] }
  0xbb   : > { %v945_v58 = vrot.slane %v647_v1, 2  ;;  %v1322_v54 = vrot.slane %v7142_v2, 2  ;;  %5408 = vmatprep.mubr.msk.f32.mxu0 %vm680_vm0, %v7149_v59  ;;  %v6339_v23 = vpop.eup %6338  ;;  %5351 = vmatprep.mubr.msk.f32.mxu1 %vm680_vm0, %v7152_v36  ;;  %v2072_v1 = vld [vmem:[%s8289_s6 + $0x28] sm:$0xff] }
  0xbc   : > { %5409 = vmatmul.mubr.msk.f32.gmra.mrb[4].mxu0 %vm680_vm0, %v7152_v36  ;;  %v1942_v19 = vadd.f32 1.0, %v6339_v23  ;;  %6348 = vrcp.f32 %v1941_v3  ;;  %v529_v23 = vmul.f32 %v7186_v24, %v6706_v50 }
  0xbd   : > { %v7159_v22 = vsel %vm929_vm3, %v943_v8, %v945_v58  ;;  %v7170_v44 = vsel %vm929_vm3, %v945_v58, %v1322_v54  ;;  %v6341_v49 = vpop.eup %6340  ;;  %v5894_v58 = vpack.c.bf16 %v1562_v55, %v1561_v61  ;;  %v2073_v55 = vld [vmem:[%s8289_s6 + $0x30] sm:$0xff] }
  0xbe   : > { %5411 = vmatprep.mubr.msk.f32.mxu0 %vm680_vm0, %v7159_v22  ;;  %5352 = vmatmul.mubr.msk.f32.gmra.mrb[6].mxu1 %vm680_vm0, %v7159_v22  ;;  %v1943_v8 = vadd.f32 1.0, %v6341_v49  ;;  %6350 = vrcp.f32 %v1942_v19 }
  0xbf   : > { %5362 = vmatprep.mubr.msk.f32.mxu1 %vm680_vm0, %v6931_v43  ;;  %v2071_v43 = vld [vmem:[%s8289_s6 + $0x20] sm:$0xff] }
  0xc0   : > { %5412 = vmatmul.mubr.msk.f32.gmra.mrb[6].mxu0 %vm680_vm0, %v7170_v44  ;;  %6352 = vrcp.f32 %v1943_v8  ;;  %v2074_v8 = vld [vmem:[%s8289_s6 + $0x38] sm:$0xff] }
  0xc1   : > { %5422 = vmatprep.mubr.msk.f32.mxu0 %vm680_vm0, %v6965_v9  ;;  %v6343_v4 = vpop.eup %6342 }
  0xc2   : > { %5363 = vmatmul.mubr.msk.f32.vlgmr.msra.gmra.mrb[0].mxu1 %vm680_vm0, %v6965_v9  ;;  %v5898_v9 = vpack.c.bf16 %v1680_v60, %v1679_v20  ;;  %v6345_v3 = vpop.eup %6344  ;;  %v7215_v49 = vmul.f32 %v6343_v4, %v6976_v34  ;;  %v1682_v20 = vld [vmem:[%s8295_s12 + $0x118] sm:$0xff]  ;;  %v5910_v60 = vpack.c.bf16 %v2074_v8, %v2073_v55 }
  0xc3   : > { %6052 = vmatpush3.bf16.msra.mxu1 %v6744_v15  ;;  %5365 = vmatprep.mubr.msk.f32.mxu1 %vm680_vm0, %v6968_v25  ;;  %v5906_v15 = vpack.c.bf16 %v2072_v1, %v2071_v43  ;;  %v6347_v50 = vpop.eup %6346  ;;  %v7226_v34 = vmul.f32 %v6345_v3, %v7007_v57  ;;  %v8329_v57 = vrot.slane %v6990_v39, 7 }
  0xc4   : > { %5423 = vmatmul.mubr.msk.f32.vlgmr.msra.gmra.mrb[0].mxu0 %vm680_vm0, %v6968_v25  ;;  %6051 = vmatprep.subr.bf16.mxu1 %v6769_v33  ;;  %v552_v25 = vrot.slane %v529_v23, 7  ;;  %v2068_v23 = vld [vmem:[%s8289_s6 + $0x8] sm:$0xff] }
  0xc5   : > { %5425 = vmatprep.mubr.msk.f32.mxu0 %vm680_vm0, %v6983_v35  ;;  %5893 = vmatpush3.bf16.msra.mxu0 %v5890_v46  ;;  %v7231_v46 = vmul.f32 %v6347_v50, %v7000_v47  ;;  %v2014_v19 = vrot.slane %v7226_v34, 7 }
  0xc6   : > { %5366 = vmatmul.mubr.msk.f32.gmra.mrb[2].mxu1 %vm680_vm0, %v6983_v35  ;;  %5895 = vmatprep.subr.bf16.mxu0 %v5894_v58  ;;  %v2013_v35 = vrot.slane %v7215_v49, 7  ;;  %v553_v61 = vsel %vm538_vm1, %v8329_v57, %v552_v25  ;;  %v557_v47 = vsel %vm538_vm1, %v552_v25, 0.0 }
  0xc7   : > { %5368 = vmatprep.mubr.msk.f32.mxu1 %vm680_vm0, %v6997_v42  ;;  %6053 = vmatpush3.bf16.msra.mxu1 %v6769_v33  ;;  %v6349_v33 = vpop.eup %6348 }
  0xc8   : > { %5426 = vmatmul.mubr.msk.f32.gmra.mrb[2].mxu0 %vm680_vm0, %v6997_v42  ;;  %5907 = vmatprep.subr.bf16.mxu1 %v5906_v15  ;;  %v6351_v42 = vpop.eup %6350  ;;  %v7252_v39 = vmul.f32 %v6349_v33, %v7041_v26  ;;  %v2015_v3 = vsel %vm538_vm1, %v2013_v35, %v2014_v19 }
  0xc9   : > { %5428 = vmatprep.mubr.msk.f32.mxu0 %vm680_vm0, %v7022_v17  ;;  %5897 = vmatpush3.bf16.msra.mxu0 %v5894_v58  ;;  %v7256_v1 = vmul.f32 %v6351_v42, %v7049_v52  ;;  %v1681_v58 = vld [vmem:[%s8295_s12 + $0x110] sm:$0xff]  ;;  %v2067_v52 = vld [vmem:[%s8289_s6] sm:$0xff] }
  0xca   : > { %5369 = vmatmul.mubr.msk.f32.gmra.mrb[4].mxu1 %vm680_vm0, %v7022_v17  ;;  %5899 = vmatprep.subr.bf16.mxu0 %v5898_v9  ;;  %v2016_v17 = vrot.slane %v7231_v46, 7  ;;  %v6353_v43 = vpop.eup %6352  ;;  %v2018_v26 = vrot.slane %v7252_v39, 7  ;;  %v5902_v42 = vpack.c.bf16 %v1682_v20, %v1681_v58  ;;  %v5914_v57 = vpack.c.bf16 %v2068_v23, %v2067_v52  ;;  %v2334_v20 = vld [vmem:[%s8289_s6 + $0x48] sm:$0xff] }
  0xcb   : > { %5371 = vmatprep.mubr.msk.f32.mxu1 %vm680_vm0, %v7035_v7  ;;  %v2020_v50 = vrot.slane %v7256_v1, 7  ;;  %v7280_v33 = vmul.f32 %v6353_v43, %v7071_v28  ;;  %v8330_v43 = vrot.slane %v6957_v6, 7  ;;  %v8331_v23 = vrot.slane %v6876_v45, 1 }
  0xcc   : > { %5429 = vmatmul.mubr.msk.f32.gmra.mrb[4].mxu0 %vm680_vm0, %v7035_v7  ;;  %v2030_v7 = vsel %vm538_vm1, 0.0, %v2013_v35  ;;  %v2017_v25 = vsel %vm538_vm1, %v2014_v19, %v2016_v17  ;;  %v2078_v35 = vrot.slane %v2015_v3, 1  ;;  %v2019_v19 = vsel %vm538_vm1, %v2016_v17, %v2018_v26 }
  0xcd   : > { %5431 = vmatprep.mubr.msk.f32.mxu0 %vm680_vm0, %v553_v61  ;;  %v2076_v4 = vrot.slane %v2030_v7, 1  ;;  %v2080_v28 = vrot.slane %v2017_v25, 1  ;;  %v1563_v3 = vsel %vm662_vm2, %v8331_v23, %v6658_v21  ;;  %v1970_v45 = vmul.f32 %v7215_v49, %v6906_v16 }
  0xce   : > { %5372 = vmatmul.mubr.msk.f32.gmra.mrb[6].mxu1 %vm680_vm0, %v553_v61  ;;  %v2022_v61 = vrot.slane %v7280_v33, 7  ;;  %v8332_v25 = vrot.slane %v7013_v56, 1  ;;  %v1973_v56 = vmul.f32 %v7252_v39, %v6920_v37  ;;  %v2037_v2 = vmul.f32 %v7280_v33, %v7087_v18 }
  0xcf   : > { %5388 = vmatprep.mubr.msk.f32.mxu1 %vm680_vm0, %v6774_v0  ;;  %v7310_v17 = vsel %vm662_vm2, %v2078_v35, %v2080_v28 }
  0xd0   : > { %5432 = vmatmul.mubr.msk.f32.gmra.mrb[6].mxu0 %vm680_vm0, %v557_v47  ;;  %v2069_v47 = vld [vmem:[%s8289_s6 + $0x10] sm:$0xff]  ;;  %v2023_v7 = vsel %vm538_vm1, %v2020_v50, %v2022_v61  ;;  %v2025_v58 = vsel %vm538_vm1, %v2022_v61, %v8330_v43 }
  0xd1   : > { %5442 = vmatprep.mubr.msk.f32.mxu0 %vm680_vm0, %v6725_v5  ;;  %v2077_v5 = vsel %vm662_vm2, %v6658_v21, %v2076_v4 }
  0xd2   : > { %5389 = vmatmul.mubr.msk.f32.vlgmr.msra.gmra.mrb[4].mxu1 %vm680_vm0, %v6785_v38 }
  0xd3   : > { %5909 = vmatpush3.bf16.msra.mxu1 %v5906_v15  ;;  %5391 = vmatprep.mubr.msk.f32.mxu1 %vm680_vm0, %v6799_v40  ;;  %v2021_v15 = vsel %vm538_vm1, %v2018_v26, %v2020_v50  ;;  %v2086_v26 = vrot.slane %v2023_v7, 1  ;;  %v2034_v7 = vmul.f32 %v7231_v46, %v7028_v51 }
  0xd4   : > { %5443 = vmatmul.mubr.msk.f32.vlgmr.msra.gmra.mrb[0].mxu0 %vm680_vm0, %v6741_v10  ;;  %5911 = vmatprep.subr.bf16.mxu1 %v5910_v60  ;;  %v2070_v10 = vld [vmem:[%s8289_s6 + $0x18] sm:$0xff]  ;;  %v2084_v55 = vrot.slane %v2021_v15, 1  ;;  %v1975_v15 = vmul.f32 %v7280_v33, %v6949_v62 }
  0xd5   : > { %5445 = vmatprep.mubr.msk.f32.mxu0 %vm680_vm0, %v6754_v27  ;;  %5901 = vmatpush3.bf16.msra.mxu0 %v5898_v9  ;;  %v7305_v27 = vsel %vm662_vm2, %v2076_v4, %v2078_v35  ;;  %v2082_v9 = vrot.slane %v2019_v19, 1  ;;  %v5918_v8 = vpack.c.bf16 %v2070_v10, %v2069_v47  ;;  %v2088_v4 = vrot.slane %v2025_v58, 1  ;;  %v2336_v35 = vld [vmem:[%s8289_s6 + $0x58] sm:$0xff]  ;;  %v2483_v47 = vld [vmem:[%s8289_s6 + $0x60] sm:$0xff] }
  0xd6   : > { %5392 = vmatmul.mubr.msk.f32.gmra.mrb[6].mxu1 %vm680_vm0, %v6884_v41  ;;  %5903 = vmatprep.subr.bf16.mxu0 %v5902_v42  ;;  %v1991_v10 = vrot.slane %v1973_v56, 7  ;;  %v2051_v23 = vrot.slane %v2034_v7, 7  ;;  %v2038_v56 = vmul.f32 %v6957_v6, %v7089_v29 }
  0xd7   : > { %5913 = vmatpush3.bf16.msra.mxu1 %v5910_v60  ;;  %5482 = vmatprep.mubr.msk.f32.mxu1 %vm680_vm0, %v2077_v5  ;;  %v7334_v60 = vsel %vm662_vm2, %v2082_v9, %v2084_v55  ;;  %v7351_v50 = vsel %vm662_vm2, %v2086_v26, %v2088_v4  ;;  %v2032_v5 = vmul.f32 %v7215_v49, %v6994_v12 }
  0xd8   : > { %5446 = vmatmul.mubr.msk.f32.gmra.mrb[2].mxu0 %vm680_vm0, %v6774_v0  ;;  %5915 = vmatprep.subr.bf16.mxu1 %v5914_v57  ;;  %v2333_v0 = vld [vmem:[%s8289_s6 + $0x40] sm:$0xff]  ;;  %v1974_v49 = vmul.f32 %v7256_v1, %v6951_v63 }
  0xd9   : > { %5448 = vmatprep.mubr.msk.f32.mxu0 %vm680_vm0, %v6785_v38  ;;  %5905 = vmatpush3.bf16.msra.mxu0 %v5902_v42  ;;  %v7329_v38 = vsel %vm662_vm2, %v2080_v28, %v2082_v9  ;;  %v5922_v52 = vpack.c.bf16 %v2334_v20, %v2333_v0  ;;  %v7366_v42 = vsel %vm662_vm2, %v2088_v4, %v8332_v25  ;;  %v2048_v9 = vrot.slane %v2032_v5, 7  ;;  %v8334_v4 = vld [vmem:[#allocation12_spill] sm:$0xff] }
  0xda   : > { %5483 = vmatmul.mubr.msk.f32.vlgmr.msra.gmra.mrb[8].mxu1 %vm680_vm0, %v7305_v27  ;;  %v1993_v58 = vrot.slane %v1974_v49, 7  ;;  %v7419_v0 = vmul.f32 %v6957_v6, %v6980_v32  ;;  %v2486_v6 = vld [vmem:[%s8289_s6 + $0x78] sm:$0xff]  ;;  %v8337_v49 = vld [vmem:[#allocation8_spill] sm:$0xff] }
  0xdb   : > { %5917 = vmatpush3.bf16.msra.mxu1 %v5914_v57  ;;  %5485 = vmatprep.mubr.msk.f32.mxu1 %vm680_vm0, %v7310_v17  ;;  %v1986_v57 = vrot.slane %v1970_v45, 7  ;;  %v2065_v20 = vsel %vm538_vm1, 0.0, %v2048_v9 }
  0xdc   : > { %5449 = vmatmul.mubr.msk.f32.gmra.mrb[4].mxu0 %vm680_vm0, %v6799_v40  ;;  %5919 = vmatprep.subr.bf16.mxu1 %v5918_v8  ;;  %v7347_v40 = vsel %vm662_vm2, %v2084_v55, %v2086_v26  ;;  %v2033_v55 = vmul.f32 %v7226_v34, %v7030_v48  ;;  %v2338_v25 = vrot.slane %v2065_v20, 2  ;;  %v2603_v20 = vld [vmem:[%s8289_s6 + $0x88] sm:$0xff] }
  0xdd   : > { %5451 = vmatprep.mubr.msk.f32.mxu0 %vm680_vm0, %v6884_v41  ;;  %v1971_v41 = vmul.f32 %v7226_v34, %v6922_v31  ;;  %v7390_v19 = vsel %vm538_vm1, 0.0, %v1986_v57  ;;  %v1995_v34 = vrot.slane %v1975_v15, 7  ;;  %v2057_v15 = vrot.slane %v2037_v2, 7 }
  0xde   : > { %5486 = vmatmul.mubr.msk.f32.gmra.mrb[10].mxu1 %vm680_vm0, %v7329_v38  ;;  %v2049_v26 = vrot.slane %v2033_v55, 7 }
  0xdf   : > { %5488 = vmatprep.mubr.msk.f32.mxu1 %vm680_vm0, %v7334_v60  ;;  %5921 = vmatpush3.bf16.msra.mxu1 %v5918_v8  ;;  %v1987_v61 = vrot.slane %v1971_v41, 7 }
  0xe0   : > { %5452 = vmatmul.mubr.msk.f32.gmra.mrb[6].mxu0 %vm680_vm0, %v1563_v3  ;;  %5923 = vmatprep.subr.bf16.mxu1 %v5922_v52  ;;  %v8335_v3 = vld [vmem:[#allocation13_spill] sm:$0xff] }
  0xe1   : > { %5462 = vmatprep.mubr.msk.f32.mxu0 %vm680_vm0, %v7098_v53  ;;  %v2335_v53 = vld [vmem:[%s8289_s6 + $0x50] sm:$0xff]  ;;  %v7409_v8 = vsel %vm538_vm1, %v1986_v57, %v1987_v61  ;;  %v2036_v45 = vmul.f32 %v7256_v1, %v8335_v3  ;;  %v7445_v57 = vsel %vm538_vm1, %v1991_v10, %v1993_v58  ;;  %v2050_v1 = vsel %vm538_vm1, %v2048_v9, %v2049_v26 }
  0xe2   : > { %5489 = vmatmul.mubr.msk.f32.gmra.mrb[12].mxu1 %vm680_vm0, %v7347_v40  ;;  %v5926_v28 = vpack.c.bf16 %v2336_v35, %v2335_v53  ;;  %v2340_v5 = vrot.slane %v2050_v1, 2  ;;  %v2059_v9 = vrot.slane %v2038_v56, 7 }
  0xe3   : > { %5491 = vmatprep.mubr.msk.f32.mxu1 %vm680_vm0, %v7351_v50  ;;  %v2055_v35 = vrot.slane %v2036_v45, 7 }
  0xe4   : > { %5463 = vmatmul.mubr.msk.f32.vlgmr.msra.gmra.mrb[0].mxu0 %vm680_vm0, %v7127_v30  ;;  %v1972_v30 = vmul.f32 %v7231_v46, %v6904_v13  ;;  %v7483_v7 = vsel %vm929_vm3, %v2338_v25, %v2340_v5 }
  0xe5   : > { %5465 = vmatprep.mubr.msk.f32.mxu0 %vm680_vm0, %v7130_v11  ;;  %v8333_v11 = vmov 0.0   ;;  %v2058_v45 = vsel %vm538_vm1, %v2055_v35, %v2057_v15 }
  0xe6   : > { %5492 = vmatmul.mubr.msk.f32.gmra.mrb[14].mxu1 %vm680_vm0, %v7366_v42 }
  0xe7   : > { %5502 = vmatprep.mubr.f32.mxu1 %v8333_v11 }
  0xe8   : > { %5466 = vmatmul.mubr.msk.f32.gmra.mrb[2].mxu0 %vm680_vm0, %v7149_v59  ;;  %v2484_v59 = vld [vmem:[%s8289_s6 + $0x68] sm:$0xff] }
  0xe9   : > { %5468 = vmatprep.mubr.msk.f32.mxu0 %vm680_vm0, %v7152_v36  ;;  %v1989_v36 = vrot.slane %v1972_v30, 7  ;;  %v5930_v43 = vpack.c.bf16 %v2484_v59, %v2483_v47  ;;  %v7475_v47 = vmul.f32 %v8337_v49, %v7113_v14 }
  0xea   : > { %5503 = vmatmul.mubr.msk.f32.vlgmr.msra.gmra.mrb[8].mxu1 %vm680_vm0, %v7390_v19 }
  0xeb   : > { %5925 = vmatpush3.bf16.msra.mxu1 %v5922_v52  ;;  %5505 = vmatprep.mubr.msk.f32.mxu1 %vm680_vm0, %v7409_v8  ;;  %v7424_v46 = vsel %vm538_vm1, %v1987_v61, %v1989_v36  ;;  %v7432_v52 = vsel %vm538_vm1, %v1989_v36, %v1991_v10  ;;  %v2052_v61 = vsel %vm538_vm1, %v2049_v26, %v2051_v23  ;;  %v2061_v26 = vrot.slane %v7475_v47, 7 }
  0xec   : > { %5469 = vmatmul.mubr.msk.f32.gmra.mrb[4].mxu0 %vm680_vm0, %v7159_v22  ;;  %5927 = vmatprep.subr.bf16.mxu1 %v5926_v28  ;;  %v2035_v22 = vmul.f32 %v7252_v39, %v8334_v4  ;;  %v1997_v39 = vrot.slane %v7419_v0, 7  ;;  %v2342_v59 = vrot.slane %v2052_v61, 2  ;;  %v2846_v0 = vld [vmem:[%s8289_s6 + $0xc0] sm:$0xff] }
  0xed   : > { %5471 = vmatprep.mubr.msk.f32.mxu0 %vm680_vm0, %v7170_v44  ;;  %v8336_v44 = vld [vmem:[#allocation10_spill] sm:$0xff]  ;;  %v7507_v2 = vsel %vm538_vm1, %v2059_v9, %v2061_v26 }
  0xee   : > { %5506 = vmatmul.mubr.msk.f32.gmra.mrb[10].mxu1 %vm680_vm0, %v7424_v46  ;;  %v1683_v41 = vsel %vm929_vm3, %v1322_v54, %v8336_v44  ;;  %v2053_v53 = vrot.slane %v2035_v22, 7  ;;  %v7453_v54 = vsel %vm538_vm1, %v1993_v58, %v1995_v34  ;;  %v7463_v33 = vsel %vm538_vm1, %v1995_v34, %v1997_v39  ;;  %v2602_v58 = vld [vmem:[%s8289_s6 + $0x80] sm:$0xff] }
  0xef   : > { %5508 = vmatprep.mubr.msk.f32.mxu1 %vm680_vm0, %v7432_v52  ;;  %5929 = vmatpush3.bf16.msra.mxu1 %v5926_v28  ;;  %v2339_v30 = vsel %vm929_vm3, %v8336_v44, %v2338_v25  ;;  %v2485_v28 = vld [vmem:[%s8289_s6 + $0x70] sm:$0xff]  ;;  %v7495_v22 = vsel %vm929_vm3, %v2340_v5, %v2342_v59  ;;  %v5938_v25 = vpack.c.bf16 %v2603_v20, %v2602_v58  ;;  %v2352_v56 = vrot.slane %v7507_v2, 2  ;;  %v3086_v2 = vld [vmem:[%s8289_s6 + $0x100] sm:$0xff] }
  0xf0   : > { %5472 = vmatmul.mubr.msk.f32.gmra.mrb[6].mxu0 %vm680_vm0, %v1683_v41  ;;  %5931 = vmatprep.subr.bf16.mxu1 %v5930_v43  ;;  %v2054_v10 = vsel %vm538_vm1, %v2051_v23, %v2053_v53  ;;  %v2056_v55 = vsel %vm538_vm1, %v2053_v53, %v2055_v35  ;;  %v5934_v36 = vpack.c.bf16 %v2486_v6, %v2485_v28  ;;  %v2348_v53 = vrot.slane %v2058_v45, 2  ;;  %v2604_v28 = vld [vmem:[%s8289_s6 + $0x90] sm:$0xff]  ;;  %v2605_v6 = vld [vmem:[%s8289_s6 + $0x98] sm:$0xff] }
  0xf1   : > { %v2344_v34 = vrot.slane %v2054_v10, 2  ;;  %v2346_v23 = vrot.slane %v2056_v55, 2  ;;  %v2060_v41 = vsel %vm538_vm1, %v2057_v15, %v2059_v9  ;;  %v5942_v15 = vpack.c.bf16 %v2605_v6, %v2604_v28  ;;  %v2725_v10 = vld [vmem:[%s8289_s6 + $0xa8] sm:$0xff]  ;;  %v8338_v45 = vld [vmem:[#allocation11_spill] sm:$0xff] }
  0xf2   : > { %5509 = vmatmul.mubr.msk.f32.gmra.mrb[12].mxu1 %vm680_vm0, %v7445_v57  ;;  %v2350_v35 = vrot.slane %v2060_v41, 2  ;;  %v2969_v6 = vld [vmem:[%s8289_s6 + $0xf8] sm:$0xff] }
  0xf3   : > { %5511 = vmatprep.mubr.msk.f32.mxu1 %vm680_vm0, %v7453_v54  ;;  %v7502_v1 = vsel %vm929_vm3, %v2342_v59, %v2344_v34  ;;  %v7518_v61 = vsel %vm929_vm3, %v2346_v23, %v2348_v53  ;;  %v2724_v59 = vld [vmem:[%s8289_s6 + $0xa0] sm:$0xff] }
  0xf4   : > { %v7523_v5 = vsel %vm929_vm3, %v2348_v53, %v2350_v35  ;;  %v5946_v9 = vpack.c.bf16 %v2725_v10, %v2724_v59  ;;  %v2967_v53 = vld [vmem:[%s8289_s6 + $0xe8] sm:$0xff]  ;;  %v3480_v10 = vld [vmem:[%s8293_s10 + $0x30] sm:$0xff] }
  0xf6   : > { %5512 = vmatmul.mubr.msk.f32.gmra.mrb[14].mxu1 %vm680_vm0, %v7463_v33 }
  0xf7   : > { %5522 = vmatprep.mubr.msk.f32.mxu1 %vm680_vm0, %v2339_v30  ;;  %v7530_v30 = vsel %vm929_vm3, %v2350_v35, %v2352_v56 }
  0xfa   : > { %5523 = vmatmul.mubr.msk.f32.vlgmr.msra.gmra.mrb[8].mxu1 %vm680_vm0, %v7483_v7 }
  0xfb   : > { %5933 = vmatpush3.bf16.msra.mxu1 %v5930_v43  ;;  %5525 = vmatprep.mubr.msk.f32.mxu1 %vm680_vm0, %v7495_v22  ;;  %v7512_v43 = vsel %vm929_vm3, %v2344_v34, %v2346_v23  ;;  %v2727_v34 = vld [vmem:[%s8289_s6 + $0xb8] sm:$0xff] }
  0xfc   : > { %5935 = vmatprep.subr.bf16.mxu1 %v5934_v36  ;;  %v2849_v23 = vld [vmem:[%s8289_s6 + $0xd8] sm:$0xff] }
  0xfe   : > { %5526 = vmatmul.mubr.msk.f32.gmra.mrb[10].mxu1 %vm680_vm0, %v7502_v1 }
  0xff   : > { %5528 = vmatprep.mubr.msk.f32.mxu1 %vm680_vm0, %v7512_v43  ;;  %5937 = vmatpush3.bf16.msra.mxu1 %v5934_v36  ;;  %v2726_v36 = vld [vmem:[%s8289_s6 + $0xb0] sm:$0xff] }
 0x100   : > { %5939 = vmatprep.subr.bf16.mxu1 %v5938_v25  ;;  %v5950_v58 = vpack.c.bf16 %v2727_v34, %v2726_v36  ;;  %v3475_v36 = vld [vmem:[%s8293_s10 + $0x8] sm:$0xff] }
 0x102   : > { %5529 = vmatmul.mubr.msk.f32.gmra.mrb[12].mxu1 %vm680_vm0, %v7518_v61 }
 0x103   : > { %5531 = vmatprep.mubr.msk.f32.mxu1 %vm680_vm0, %v7523_v5 }
 0x106   : > { %5532 = vmatmul.mubr.msk.f32.gmra.mrb[14].mxu1 %vm680_vm0, %v7530_v30 }
 0x107   : > { %5542 = vmatprep.mubr.msk.f32.mxu1 %vm680_vm0, %v7390_v19  ;;  %v7554_v19 = vmul.f32 %v8337_v49, %v7186_v24 }
 0x109   : > { %v1999_v55 = vrot.slane %v7554_v19, 7  ;;  %v3481_v19 = vld [vmem:[%s8293_s10 + $0x38] sm:$0xff] }
 0x10a   : > { %5543 = vmatmul.mubr.msk.f32.vlgmr.msra.gmra.mrb[8].mxu1 %vm680_vm0, %v7409_v8 }
 0x10b   : > { %5941 = vmatpush3.bf16.msra.mxu1 %v5938_v25  ;;  %5545 = vmatprep.mubr.msk.f32.mxu1 %vm680_vm0, %v7424_v46  ;;  %v2000_v49 = vsel %vm538_vm1, %v1997_v39, %v1999_v55  ;;  %v2847_v39 = vld [vmem:[%s8289_s6 + $0xc8] sm:$0xff]  ;;  %v2966_v25 = vld [vmem:[%s8289_s6 + $0xe0] sm:$0xff] }
 0x10c   : > { %5943 = vmatprep.subr.bf16.mxu1 %v5942_v15  ;;  %v5954_v20 = vpack.c.bf16 %v2847_v39, %v2846_v0  ;;  %v5962_v35 = vpack.c.bf16 %v2967_v53, %v2966_v25 }
 0x10e   : > { %5546 = vmatmul.mubr.msk.f32.gmra.mrb[10].mxu1 %vm680_vm0, %v7432_v52 }
 0x10f   : > { %5548 = vmatprep.mubr.msk.f32.mxu1 %vm680_vm0, %v7445_v57  ;;  %5945 = vmatpush3.bf16.msra.mxu1 %v5942_v15 }
 0x110   : > { %5947 = vmatprep.subr.bf16.mxu1 %v5946_v9 }
 0x112   : > { %5549 = vmatmul.mubr.msk.f32.gmra.mrb[12].mxu1 %vm680_vm0, %v7453_v54 }
 0x113   : > { %5551 = vmatprep.mubr.msk.f32.mxu1 %vm680_vm0, %v7463_v33 }
 0x116   : > { %5552 = vmatmul.mubr.msk.f32.gmra.mrb[14].mxu1 %vm680_vm0, %v2000_v49 }
 0x117   : > { %5562 = vmatprep.mubr.msk.f32.mxu1 %vm680_vm0, %v7305_v27  ;;  %v2848_v27 = vld [vmem:[%s8289_s6 + $0xd0] sm:$0xff] }
 0x118   : > { %v5958_v41 = vpack.c.bf16 %v2849_v23, %v2848_v27 }
 0x11a   : > { %5563 = vmatmul.mubr.msk.f32.vlgmr.msra.gmra.mrb[8].mxu1 %vm680_vm0, %v7310_v17 }
 0x11b   : > { %5949 = vmatpush3.bf16.msra.mxu1 %v5946_v9  ;;  %5565 = vmatprep.mubr.msk.f32.mxu1 %vm680_vm0, %v7329_v38 }
 0x11c   : > { %5951 = vmatprep.subr.bf16.mxu1 %v5950_v58 }
 0x11e   : > { %5566 = vmatmul.mubr.msk.f32.gmra.mrb[10].mxu1 %vm680_vm0, %v7334_v60 }
 0x11f   : > { %5568 = vmatprep.mubr.msk.f32.mxu1 %vm680_vm0, %v7347_v40  ;;  %5953 = vmatpush3.bf16.msra.mxu1 %v5950_v58  ;;  %v4880_v58 = vld [vmem:[%s8290_s7] ss:$0 sm:$0xff] }
 0x120   : > { %5955 = vmatprep.subr.bf16.mxu1 %v5954_v20 }
 0x122   : > { %5569 = vmatmul.mubr.msk.f32.gmra.mrb[12].mxu1 %vm680_vm0, %v7351_v50 }
 0x123   : > { %5571 = vmatprep.mubr.msk.f32.mxu1 %vm680_vm0, %v7366_v42 }
 0x126   : > { %5572 = vmatmul.mubr.msk.f32.gmra.mrb[14].mxu1 %vm680_vm0, %v8338_v45 }
 0x127   : > { %5582 = vmatprep.mubr.msk.f32.mxu1 %vm680_vm0, %v7483_v7  ;;  %v2066_v7 = vsel %vm538_vm1, %v2061_v26, 0.0  ;;  %v2968_v26 = vld [vmem:[%s8289_s6 + $0xf0] sm:$0xff] }
 0x128   : > { %v2729_v28 = vrot.slane %v2066_v7, 2  ;;  %v5966_v15 = vpack.c.bf16 %v2969_v6, %v2968_v26 }
 0x12a   : > { %5583 = vmatmul.mubr.msk.f32.vlgmr.msra.gmra.mrb[8].mxu1 %vm680_vm0, %v7495_v22  ;;  %v2730_v47 = vsel %vm929_vm3, %v2352_v56, %v2729_v28  ;;  %v3087_v56 = vld [vmem:[%s8289_s6 + $0x108] sm:$0xff] }
 0x12b   : > { %5957 = vmatpush3.bf16.msra.mxu1 %v5954_v20  ;;  %5585 = vmatprep.mubr.msk.f32.mxu1 %vm680_vm0, %v7502_v1  ;;  %v5970_v59 = vpack.c.bf16 %v3087_v56, %v3086_v2 }
 0x12c   : > { %5959 = vmatprep.subr.bf16.mxu1 %v5958_v41 }
 0x12e   : > { %5586 = vmatmul.mubr.msk.f32.gmra.mrb[10].mxu1 %vm680_vm0, %v7512_v43 }
 0x12f   : > { %5588 = vmatprep.mubr.msk.f32.mxu1 %vm680_vm0, %v7518_v61  ;;  %5961 = vmatpush3.bf16.msra.mxu1 %v5958_v41 }
 0x130   : > { %5963 = vmatprep.subr.bf16.mxu1 %v5962_v35 }
 0x132   : > { %5589 = vmatmul.mubr.msk.f32.gmra.mrb[12].mxu1 %vm680_vm0, %v7523_v5 }
 0x133   : > { %5591 = vmatprep.mubr.msk.f32.mxu1 %vm680_vm0, %v7530_v30 }
 0x136   : > { %5592 = vmatmul.mubr.msk.f32.gmra.mrb[14].mxu1 %vm680_vm0, %v2730_v47 }
 0x137   : > { %5602 = vmatprep.mubr.msk.f32.mxu1 %vm680_vm0, %v7409_v8  ;;  %v2004_v8 = vsel %vm538_vm1, %v1999_v55, 0.0  ;;  %v5982_v55 = vpack.c.bf16 %v3481_v19, %v3480_v10 }
 0x13a   : > { %5603 = vmatmul.mubr.msk.f32.vlgmr.msra.gmra.mrb[8].mxu1 %vm680_vm0, %v7424_v46  ;;  %v3088_v46 = vld [vmem:[%s8289_s6 + $0x110] sm:$0xff] }
 0x13b   : > { %5965 = vmatpush3.bf16.msra.mxu1 %v5962_v35  ;;  %5605 = vmatprep.mubr.msk.f32.mxu1 %vm680_vm0, %v7432_v52  ;;  %v3089_v52 = vld [vmem:[%s8289_s6 + $0x118] sm:$0xff] }
 0x13c   : > { %5967 = vmatprep.subr.bf16.mxu1 %v5966_v15 }
 0x13e   : > { %5606 = vmatmul.mubr.msk.f32.gmra.mrb[10].mxu1 %vm680_vm0, %v7445_v57  ;;  %v5974_v57 = vpack.c.bf16 %v3089_v52, %v3088_v46 }
 0x13f   : > { %5608 = vmatprep.mubr.msk.f32.mxu1 %vm680_vm0, %v7453_v54  ;;  %5969 = vmatpush3.bf16.msra.mxu1 %v5966_v15 }
 0x140   : > { %5971 = vmatprep.subr.bf16.mxu1 %v5970_v59 }
 0x142   : > { %5609 = vmatmul.mubr.msk.f32.gmra.mrb[12].mxu1 %vm680_vm0, %v7463_v33 }
 0x143   : > { %5611 = vmatprep.mubr.msk.f32.mxu1 %vm680_vm0, %v2000_v49  ;;  %v3474_v49 = vld [vmem:[%s8293_s10] sm:$0xff] }
 0x144   : > { %v7732_v34 = vpack.c.bf16 %v3475_v36, %v3474_v49 }
 0x146   : > { %5612 = vmatmul.mubr.msk.f32.gmra.mrb[14].mxu1 %vm680_vm0, %v2004_v8 }
 0x147   : > { %5622 = vmatprep.mubr.msk.f32.mxu1 %vm680_vm0, %v7310_v17  ;;  %v8339_v17 = vld [vmem:[#allocation9_spill] sm:$0xff] }
 0x14a   : > { %5623 = vmatmul.mubr.msk.f32.vlgmr.msra.gmra.mrb[8].mxu1 %vm680_vm0, %v7329_v38  ;;  %v8340_v38 = vrot.slane %v8339_v17, 1 }
 0x14b   : > { %5973 = vmatpush3.bf16.msra.mxu1 %v5970_v59  ;;  %5625 = vmatprep.mubr.msk.f32.mxu1 %vm680_vm0, %v7334_v60  ;;  %v3090_v60 = vsel %vm929_vm3, %v2729_v28, %v8336_v44 }
 0x14c   : > { %5975 = vmatprep.subr.bf16.mxu1 %v5974_v57  ;;  %v2970_v54 = vsel %vm662_vm2, %v8340_v38, %v6658_v21 }
 0x14e   : > { %5626 = vmatmul.mubr.msk.f32.gmra.mrb[10].mxu1 %vm680_vm0, %v7347_v40 }
 0x14f   : > { %5628 = vmatprep.mubr.msk.f32.mxu1 %vm680_vm0, %v7351_v50  ;;  %5977 = vmatpush3.bf16.msra.mxu1 %v5974_v57 }
 0x152   : > { %5629 = vmatmul.mubr.msk.f32.gmra.mrb[12].mxu1 %vm680_vm0, %v7366_v42 }
 0x153   : > { %5631 = vmatprep.mubr.msk.f32.mxu1 %vm680_vm0, %v8338_v45 }
 0x156   : > { %5632 = vmatmul.mubr.msk.f32.gmra.mrb[14].mxu1 %vm680_vm0, %v2970_v54 }
 0x157   : > { %5642 = vmatprep.mubr.msk.f32.mxu1 %vm680_vm0, %v7495_v22 }
 0x15a   : > { %5643 = vmatmul.mubr.msk.f32.vlgmr.msra.gmra.mrb[8].mxu1 %vm680_vm0, %v7502_v1 }
 0x15b   : > { %5645 = vmatprep.mubr.msk.f32.mxu1 %vm680_vm0, %v7512_v43 }
 0x15e   : > { %5646 = vmatmul.mubr.msk.f32.gmra.mrb[10].mxu1 %vm680_vm0, %v7518_v61 }
 0x15f   : > { %5648 = vmatprep.mubr.msk.f32.mxu1 %vm680_vm0, %v7523_v5  ;;  %v3478_v5 = vld [vmem:[%s8293_s10 + $0x20] sm:$0xff] }
 0x162   : > { %5649 = vmatmul.mubr.msk.f32.gmra.mrb[12].mxu1 %vm680_vm0, %v7530_v30  ;;  %v3479_v30 = vld [vmem:[%s8293_s10 + $0x28] sm:$0xff] }
 0x163   : > { %5651 = vmatprep.mubr.msk.f32.mxu1 %vm680_vm0, %v2730_v47  ;;  %v5978_v9 = vpack.c.bf16 %v3479_v30, %v3478_v5 }
 0x165   : > { %5979 = vmatprep.subr.bf16.mxu0 %v5978_v9 }
 0x166   : > { %5652 = vmatmul.mubr.msk.f32.gmra.mrb[14].mxu1 %vm680_vm0, %v3090_v60  ;;  %5981 = vmatpush3.bf16.msra.mxu0 %v5978_v9 }
 0x167   : > { %5983 = vmatprep.subr.bf16.mxu0 %v5982_v55 }
 0x16a   : > { %5985 = vmatpush3.bf16.msra.mxu0 %v5982_v55 }
 0x16b   : > { %5987 = vmatprep.subr.bf16.mxu0 %v7732_v34 }
 0x195   : > { %v7698_v40 = vpop.f32.mrb[0].mxu1 }
 0x196   : > { %v7700_v50 = vpop.f32.mrb[1].mxu1 }
 0x199   : > { %v7702_v42 = vpop.f32.mrb[2].mxu1 }
 0x19a   : > { %v7704_v33 = vpop.f32.mrb[3].mxu1 }
 0x1a5   : > { %v7706_v22 = vpop.f32.mrb[4].mxu1 }
 0x1a6   : > { %v7708_v1 = vpop.f32.mrb[5].mxu1 }
 0x1a9   : > { %v7710_v43 = vpop.f32.mrb[6].mxu1 }
 0x1aa   : > { %v7712_v61 = vpop.f32.mrb[7].mxu1 }
 0x22d   : > { %v5644_v0 = vpop.f32.mrb[8].mxu1 }
 0x22e   : > { %v3214_v39 = vadd.f32 %v5644_v0, %v4880_v58  ;;  %v3159_v20 = vpop.f32.mrb[9].mxu1 }
 0x22f   : > { %v3213_v27 = vadd.f32 %v4880_v58, %v3159_v20 }
 0x230   : > { %v3224_v23 = vsel %vm680_vm0, %v3214_v39, 0.0 }
 0x231   : > { %v3223_v45 = vsel %vm680_vm0, %v3213_v27, 0.0  ;;  %v5647_v41 = vpop.f32.mrb[10].mxu1 }
 0x232   : > { %v3225_v25 = vadd.f32 %v3224_v23, %v3223_v45  ;;  %v3169_v53 = vpop.f32.mrb[11].mxu1  ;;  %v3216_v35 = vadd.f32 %v5647_v41, %v4880_v58 }
 0x233   : > { %v3215_v7 = vadd.f32 %v4880_v58, %v3169_v53 }
 0x234   : > { %v3228_v15 = vsel %vm680_vm0, %v3216_v35, 0.0 }
 0x235   : > { %v3226_v28 = vsel %vm680_vm0, %v3215_v7, 0.0  ;;  %v5650_v47 = vpop.f32.mrb[12].mxu1 }
 0x236   : > { %v3227_v26 = vadd.f32 %v3226_v28, %v3225_v25  ;;  %v3179_v6 = vpop.f32.mrb[13].mxu1  ;;  %v3218_v2 = vadd.f32 %v5650_v47, %v4880_v58 }
 0x237   : > { %v3217_v56 = vadd.f32 %v4880_v58, %v3179_v6 }
 0x238   : > { %v3229_v59 = vadd.f32 %v3228_v15, %v3227_v26  ;;  %v3232_v17 = vsel %vm680_vm0, %v3218_v2, 0.0 }
 0x239   : > { %v3230_v8 = vsel %vm680_vm0, %v3217_v56, 0.0  ;;  %v5653_v46 = vpop.f32.mrb[14].mxu1 }
 0x23a   : > { %v3231_v52 = vadd.f32 %v3230_v8, %v3229_v59  ;;  %v3189_v57 = vpop.f32.mrb[15].mxu1  ;;  %v3220_v38 = vadd.f32 %v5653_v46, %v4880_v58 }
 0x23b   : > { %v3219_v54 = vadd.f32 %v4880_v58, %v3189_v57 }
 0x23c   : > { %v3233_v60 = vadd.f32 %v3232_v17, %v3231_v52  ;;  %v3236_v10 = vsel %vm680_vm0, %v3220_v38, 0.0 }
 0x23d   : > { %v3234_v5 = vsel %vm680_vm0, %v3219_v54, 0.0 }
 0x23e   : > { %v3235_v30 = vadd.f32 %v3234_v5, %v3233_v60 }
 0x240   : > { %v3237_v9 = vadd.f32 %v3236_v10, %v3235_v30 }
 0x242   : > { %v3238_v19 = vrot.slane %v3237_v9, 4 }
 0x244   : > { %v3239_v55 = vadd.f32 %v3238_v19, %v3237_v9 }
 0x246   : > { %v3240_v49 = vrot.slane %v3239_v55, 2 }
 0x248   : > { %v3241_v36 = vadd.f32 %v3240_v49, %v3239_v55 }
 0x24a   : > { %v3242_v0 = vrot.slane %v3241_v36, 1 }
 0x24c   : > { %v3243_v20 = vadd.f32 %v3242_v0, %v3241_v36 }
 0x24e   : > { %v3244_v23 = vmul.f32 0.015625, %v3243_v20 }
 0x250   : > { %v3245_v45 = vsub.f32 %v3213_v27, %v3244_v23  ;;  %v3246_v41 = vsub.f32 %v3214_v39, %v3244_v23  ;;  %v3247_v25 = vsub.f32 %v3215_v7, %v3244_v23  ;;  %v3248_v53 = vsub.f32 %v3216_v35, %v3244_v23 }
 0x251   : > { %v3249_v28 = vsub.f32 %v3217_v56, %v3244_v23  ;;  %v3250_v58 = vsub.f32 %v3218_v2, %v3244_v23  ;;  %v3251_v47 = vsub.f32 %v3219_v54, %v3244_v23  ;;  %v3252_v26 = vsub.f32 %v3220_v38, %v3244_v23 }
 0x252   : > { %v3253_v6 = vmul.f32 %v3245_v45, %v3245_v45  ;;  %v3254_v15 = vmul.f32 %v3246_v41, %v3246_v41  ;;  %v3255_v59 = vmul.f32 %v3247_v25, %v3247_v25  ;;  %v3256_v8 = vmul.f32 %v3248_v53, %v3248_v53 }
 0x253   : > { %v3257_v17 = vmul.f32 %v3249_v28, %v3249_v28  ;;  %v3258_v39 = vmul.f32 %v3250_v58, %v3250_v58  ;;  %v3259_v2 = vmul.f32 %v3251_v47, %v3251_v47  ;;  %v3260_v54 = vmul.f32 %v3252_v26, %v3252_v26 }
 0x254   : > { %v3261_v46 = vsel %vm680_vm0, %v3253_v6, 0.0  ;;  %v3262_v52 = vsel %vm680_vm0, %v3254_v15, 0.0  ;;  %v3264_v60 = vsel %vm680_vm0, %v3255_v59, 0.0  ;;  %v3266_v35 = vsel %vm680_vm0, %v3256_v8, 0.0 }
 0x255   : > { %v3263_v57 = vadd.f32 %v3262_v52, %v3261_v46  ;;  %v3268_v56 = vsel %vm680_vm0, %v3257_v17, 0.0  ;;  %v3270_v5 = vsel %vm680_vm0, %v3258_v39, 0.0  ;;  %v3272_v10 = vsel %vm680_vm0, %v3259_v2, 0.0  ;;  %v4881_v46 = vld [vmem:[%s8291_s8] ss:$0 sm:$0xff] }
 0x256   : > { %v3274_v19 = vsel %vm680_vm0, %v3260_v54, 0.0 }
 0x257   : > { %v3265_v27 = vadd.f32 %v3264_v60, %v3263_v57 }
 0x259   : > { %v3267_v7 = vadd.f32 %v3266_v35, %v3265_v27  ;;  %v4882_v27 = vld [vmem:[%s8292_s9] ss:$0 sm:$0xff] }
 0x25b   : > { %v3269_v38 = vadd.f32 %v3268_v56, %v3267_v7 }
 0x25d   : > { %v3271_v30 = vadd.f32 %v3270_v5, %v3269_v38 }
 0x25f   : > { %v3273_v9 = vadd.f32 %v3272_v10, %v3271_v30 }
 0x261   : > { %v3275_v55 = vadd.f32 %v3274_v19, %v3273_v9 }
 0x263   : > { %v3276_v49 = vrot.slane %v3275_v55, 4 }
 0x265   : > { %v3277_v36 = vadd.f32 %v3276_v49, %v3275_v55 }
 0x267   : > { %v3278_v0 = vrot.slane %v3277_v36, 2 }
 0x269   : > { %v3279_v20 = vadd.f32 %v3278_v0, %v3277_v36 }
 0x26b   : > { %v3280_v23 = vrot.slane %v3279_v20, 1 }
 0x26d   : > { %v3281_v6 = vadd.f32 %v3280_v23, %v3279_v20 }
 0x26f   : > { %v3282_v15 = vmul.f32 0.015625, %v3281_v6 }
 0x271   : > { %v3283_v59 = vadd.f32 1e-05, %v3282_v15 }
 0x273   : > { %6354 = vrsqrt.f32 %v3283_v59 }
 0x27d   : > { %v6355_v8 = vpop.eup %6354 }
 0x27e   : > { %v3286_v52 = vmul.f32 %v6355_v8, %v3246_v41  ;;  %v3287_v57 = vmul.f32 %v6355_v8, %v3247_v25  ;;  %v3288_v17 = vmul.f32 %v6355_v8, %v3248_v53  ;;  %v3289_v60 = vmul.f32 %v6355_v8, %v3249_v28 }
 0x27f   : > { %v3290_v39 = vmul.f32 %v6355_v8, %v3250_v58  ;;  %v3291_v35 = vmul.f32 %v6355_v8, %v3251_v47  ;;  %v3292_v7 = vmul.f32 %v6355_v8, %v3252_v26  ;;  %v3285_v2 = vmul.f32 %v6355_v8, %v3245_v45 }
 0x280   : > { %v3303_v56 = vmul.f32 %v4881_v46, %v3289_v60  ;;  %v3300_v38 = vmul.f32 %v4881_v46, %v3286_v52  ;;  %v3301_v54 = vmul.f32 %v4881_v46, %v3287_v57  ;;  %v3302_v5 = vmul.f32 %v4881_v46, %v3288_v17 }
 0x281   : > { %v3304_v30 = vmul.f32 %v4881_v46, %v3290_v39  ;;  %v3305_v10 = vmul.f32 %v4881_v46, %v3291_v35  ;;  %v3306_v9 = vmul.f32 %v4881_v46, %v3292_v7  ;;  %v3299_v19 = vmul.f32 %v4881_v46, %v3285_v2 }
 0x282   : > { %v3314_v41 = vadd.f32 %v4882_v27, %v3300_v38  ;;  %v7760_v25 = vadd.f32 %v4882_v27, %v3301_v54  ;;  %v7762_v53 = vadd.f32 %v4882_v27, %v3302_v5  ;;  %v7764_v49 = vadd.f32 %v4882_v27, %v3303_v56 }
 0x283   : > { %v3319_v28 = vadd.f32 %v4882_v27, %v3305_v10  ;;  %v3313_v55 = vadd.f32 %v4882_v27, %v3299_v19  ;;  %v7766_v47 = vadd.f32 %v4882_v27, %v3304_v30  ;;  %v7769_v0 = vadd.f32 %v4882_v27, %v3306_v9  ;;  %v3476_v30 = vld [vmem:[%s8293_s10 + $0x10] sm:$0xff]  ;;  %v3477_v10 = vld [vmem:[%s8293_s10 + $0x18] sm:$0xff]  ;;  %v3740_v19 = vld [vmem:[%s8293_s10 + $0x40] sm:$0xff] }
 0x284   : > { %v4884_v58 = vmul.f32 -1.442695, %v3314_v41  ;;  %v4885_v36 = vmul.f32 -1.442695, %v7760_v25  ;;  %v4886_v20 = vmul.f32 -1.442695, %v7762_v53 }
 0x285   : > { %v4889_v45 = vmul.f32 -1.442695, %v3319_v28  ;;  %v4883_v26 = vmul.f32 -1.442695, %v3313_v55  ;;  %v4887_v23 = vmul.f32 -1.442695, %v7764_v49 }
 0x286   : > { %6356 = vpow2.f32 %v4884_v58  ;;  %v4888_v6 = vmul.f32 -1.442695, %v7766_v47  ;;  %v4890_v15 = vmul.f32 -1.442695, %v7769_v0  ;;  %v3741_v58 = vld [vmem:[%s8293_s10 + $0x48] sm:$0xff] }
 0x287   : > { %6358 = vpow2.f32 %v4889_v45 }
 0x288   : > { %6360 = vpow2.f32 %v4883_v26 }
 0x289   : > { %6362 = vpow2.f32 %v4885_v36 }
 0x28a   : > { %6364 = vpow2.f32 %v4886_v20 }
 0x28b   : > { %6366 = vpow2.f32 %v4887_v23  ;;  %v7787_v23 = vpack.c.bf16 %v3477_v10, %v3476_v30 }
 0x28c   : > { %6368 = vpow2.f32 %v4888_v6 }
 0x28d   : > { %6370 = vpow2.f32 %v4890_v15 }
 0x290   : > { %v6357_v59 = vpop.eup %6356 }
 0x291   : > { %v6359_v8 = vpop.eup %6358  ;;  %v3346_v46 = vadd.f32 1.0, %v6357_v59 }
 0x292   : > { %v6361_v52 = vpop.eup %6360  ;;  %v3351_v57 = vadd.f32 1.0, %v6359_v8  ;;  %v7791_v8 = vpack.c.bf16 %v3741_v58, %v3740_v19 }
 0x293   : > { %v6363_v17 = vpop.eup %6362  ;;  %v3345_v60 = vadd.f32 1.0, %v6361_v52  ;;  %6372 = vrcp.f32 %v3346_v46 }
 0x294   : > { %v6365_v27 = vpop.eup %6364  ;;  %6374 = vrcp.f32 %v3351_v57  ;;  %v3347_v39 = vadd.f32 1.0, %v6363_v17 }
 0x295   : > { %v6367_v35 = vpop.eup %6366  ;;  %6376 = vrcp.f32 %v3345_v60  ;;  %v3348_v7 = vadd.f32 1.0, %v6365_v27 }
 0x296   : > { %v6369_v2 = vpop.eup %6368  ;;  %6378 = vrcp.f32 %v3347_v39  ;;  %v3349_v56 = vadd.f32 1.0, %v6367_v35 }
 0x297   : > { %v6371_v38 = vpop.eup %6370  ;;  %6380 = vrcp.f32 %v3348_v7  ;;  %v3350_v54 = vadd.f32 1.0, %v6369_v2 }
 0x298   : > { %6382 = vrcp.f32 %v3349_v56  ;;  %v3352_v5 = vadd.f32 1.0, %v6371_v38 }
 0x299   : > { %6384 = vrcp.f32 %v3350_v54 }
 0x29a   : > { %6386 = vrcp.f32 %v3352_v5 }
 0x29d   : > { %v6373_v9 = vpop.eup %6372 }
 0x29e   : > { %v6375_v45 = vpop.eup %6374  ;;  %v3370_v26 = vmul.f32 %v6373_v9, %v3314_v41 }
 0x29f   : > { %v6377_v36 = vpop.eup %6376  ;;  %v3375_v20 = vmul.f32 %v6375_v45, %v3319_v28 }
 0x2a0   : > { %v6379_v6 = vpop.eup %6378  ;;  %v7789_v15 = vmul.f32 %v6377_v36, %v3313_v55  ;;  %v3421_v59 = vrot.slane %v3370_v26, 7  ;;  %v3378_v46 = vmul.f32 %v3370_v26, %v6922_v31  ;;  %v7801_v41 = vmul.f32 %v3370_v26, %v7030_v48 }
 0x2a1   : > { %v6381_v52 = vpop.eup %6380  ;;  %v7795_v57 = vmul.f32 %v6379_v6, %v7760_v25  ;;  %v3431_v17 = vrot.slane %v3375_v20, 7  ;;  %v7798_v60 = vmul.f32 %v3375_v20, %v6980_v32  ;;  %v7810_v31 = vmul.f32 %v3375_v20, %v7089_v29 }
 0x2a2   : > { %v6383_v28 = vpop.eup %6382  ;;  %v3420_v55 = vrot.slane %v7789_v15, 7  ;;  %v3372_v27 = vmul.f32 %v6381_v52, %v7762_v53  ;;  %v7807_v39 = vmul.f32 %v7789_v15, %v6906_v16  ;;  %v3394_v48 = vrot.slane %v3378_v46, 7 }
 0x2a3   : > { %v6385_v25 = vpop.eup %6384  ;;  %v3423_v35 = vrot.slane %v7795_v57, 7  ;;  %v7814_v32 = vmul.f32 %v6383_v28, %v7764_v49  ;;  %v3379_v7 = vmul.f32 %v7795_v57, %v6904_v13 }
 0x2a4   : > { %v6387_v2 = vpop.eup %6386  ;;  %v3437_v53 = vsel %vm538_vm1, 0.0, %v3420_v55  ;;  %v3422_v56 = vsel %vm538_vm1, %v3420_v55, %v3421_v59  ;;  %v3425_v16 = vrot.slane %v3372_v27, 7  ;;  %v3374_v38 = vmul.f32 %v6385_v25, %v7766_v47 }
 0x2a5   : > { %v3483_v29 = vrot.slane %v3437_v53, 1  ;;  %v3485_v54 = vrot.slane %v3422_v56, 1  ;;  %v3424_v5 = vsel %vm538_vm1, %v3421_v59, %v3423_v35  ;;  %v3427_v30 = vrot.slane %v7814_v32, 7 }
 0x2a6   : > { %v3487_v49 = vrot.slane %v3424_v5, 1  ;;  %v3426_v10 = vsel %vm538_vm1, %v3423_v35, %v3425_v16  ;;  %v3429_v9 = vrot.slane %v3374_v38, 7  ;;  %v7825_v13 = vmul.f32 %v6387_v2, %v7769_v0 }
 0x2a7   : > { %v3484_v19 = vsel %vm662_vm2, %v6658_v21, %v3483_v29  ;;  %v7830_v58 = vsel %vm662_vm2, %v3483_v29, %v3485_v54  ;;  %v3489_v47 = vrot.slane %v3426_v10, 1  ;;  %v3428_v45 = vsel %vm538_vm1, %v3425_v16, %v3427_v30 }
 0x2a8   : > { %5662 = vmatprep.mubr.msk.f32.mxu0 %vm680_vm0, %v3484_v19  ;;  %v7835_v26 = vsel %vm662_vm2, %v3485_v54, %v3487_v49  ;;  %v3491_v36 = vrot.slane %v3428_v45, 1  ;;  %v3430_v20 = vsel %vm538_vm1, %v3427_v30, %v3429_v9  ;;  %v3432_v0 = vsel %vm538_vm1, %v3429_v9, %v3431_v17 }
 0x2a9   : > { %5663 = vmatmul.mubr.msk.f32.vlgmr.msra.gmra.mrb[0].mxu0 %vm680_vm0, %v7830_v58  ;;  %v7842_v6 = vsel %vm662_vm2, %v3487_v49, %v3489_v47  ;;  %v3493_v59 = vrot.slane %v3430_v20, 1  ;;  %v3495_v46 = vrot.slane %v3432_v0, 1  ;;  %v3433_v52 = vrot.slane %v7825_v13, 7 }
 0x2aa   : > { %5989 = vmatpush3.bf16.msra.mxu0 %v7732_v34  ;;  %5665 = vmatprep.mubr.msk.f32.mxu0 %vm680_vm0, %v7835_v26  ;;  %v7849_v28 = vsel %vm662_vm2, %v3489_v47, %v3491_v36  ;;  %v3393_v55 = vrot.slane %v7807_v39, 7  ;;  %v3396_v25 = vrot.slane %v3379_v7, 7  ;;  %v3380_v35 = vmul.f32 %v3372_v27, %v6920_v37 }
 0x2ab   : > { %5991 = vmatprep.subr.bf16.mxu0 %v7787_v23  ;;  %v7855_v2 = vsel %vm662_vm2, %v3491_v36, %v3493_v59  ;;  %v7858_v53 = vsel %vm662_vm2, %v3493_v59, %v3495_v46  ;;  %v7863_v34 = vsel %vm538_vm1, %v3431_v17, %v3433_v52  ;;  %v3381_v56 = vmul.f32 %v7814_v32, %v6951_v63 }
 0x2ac   : > { %v3497_v39 = vrot.slane %v7863_v34, 1  ;;  %v7869_v37 = vsel %vm538_vm1, %v3393_v55, %v3394_v48  ;;  %v7872_v7 = vsel %vm538_vm1, %v3394_v48, %v3396_v25  ;;  %v3404_v16 = vrot.slane %v7798_v60, 7  ;;  %v3892_v60 = vld [vmem:[%s8293_s10 + $0x70] sm:$0xff] }
 0x2ad   : > { %5666 = vmatmul.mubr.msk.f32.gmra.mrb[2].mxu0 %vm680_vm0, %v7842_v6  ;;  %v3398_v29 = vrot.slane %v3380_v35, 7  ;;  %v3400_v54 = vrot.slane %v3381_v56, 7  ;;  %v3382_v17 = vmul.f32 %v3374_v38, %v6949_v62  ;;  %v3439_v63 = vmul.f32 %v7789_v15, %v6994_v12 }
 0x2ae   : > { %5668 = vmatprep.mubr.msk.f32.mxu0 %vm680_vm0, %v7849_v28  ;;  %5993 = vmatpush3.bf16.msra.mxu0 %v7787_v23  ;;  %v7886_v48 = vsel %vm662_vm2, %v3495_v46, %v3497_v39  ;;  %v3456_v5 = vrot.slane %v7801_v41, 7  ;;  %v3441_v30 = vmul.f32 %v7795_v57, %v7028_v51  ;;  %v3442_v62 = vmul.f32 %v3372_v27, %v8334_v4  ;;  %v3742_v51 = vld [vmem:[%s8293_s10 + $0x50] sm:$0xff]  ;;  %v3743_v4 = vld [vmem:[%s8293_s10 + $0x58] sm:$0xff] }
 0x2af   : > { %5995 = vmatprep.subr.bf16.mxu0 %v7791_v8  ;;  %v7894_v12 = vsel %vm538_vm1, %v3396_v25, %v3398_v29  ;;  %v7897_v15 = vsel %vm538_vm1, %v3398_v29, %v3400_v54  ;;  %v3402_v23 = vrot.slane %v3382_v17, 7  ;;  %v3455_v49 = vrot.slane %v3439_v63, 7 }
 0x2b0   : > { %v3458_v10 = vrot.slane %v3441_v30, 7  ;;  %v3460_v9 = vrot.slane %v3442_v62, 7  ;;  %v3443_v41 = vmul.f32 %v7814_v32, %v8335_v3  ;;  %v3444_v19 = vmul.f32 %v3374_v38, %v7087_v18 }
 0x2b1   : > { %5669 = vmatmul.mubr.msk.f32.gmra.mrb[4].mxu0 %vm680_vm0, %v7855_v2  ;;  %v7911_v57 = vsel %vm538_vm1, %v3400_v54, %v3402_v23  ;;  %v7916_v3 = vsel %vm538_vm1, %v3402_v23, %v3404_v16  ;;  %v3472_v18 = vsel %vm538_vm1, 0.0, %v3455_v49  ;;  %v3457_v27 = vsel %vm538_vm1, %v3455_v49, %v3456_v5 }
 0x2b2   : > { %5671 = vmatprep.mubr.msk.f32.mxu0 %vm680_vm0, %v7858_v53  ;;  %v3745_v32 = vrot.slane %v3472_v18, 2  ;;  %v3747_v38 = vrot.slane %v3457_v27, 2  ;;  %v3459_v47 = vsel %vm538_vm1, %v3456_v5, %v3458_v10  ;;  %v3461_v45 = vsel %vm538_vm1, %v3458_v10, %v3460_v9 }
 0x2b3   : > { %v3749_v36 = vrot.slane %v3459_v47, 2  ;;  %v3751_v20 = vrot.slane %v3461_v45, 2  ;;  %v3462_v0 = vrot.slane %v3443_v41, 7  ;;  %v3464_v59 = vrot.slane %v3444_v19, 7 }
 0x2b4   : > { %v5998_v46 = vpack.c.bf16 %v3743_v4, %v3742_v51  ;;  %v7925_v25 = vsel %vm929_vm3, %v3745_v32, %v3747_v38  ;;  %v3466_v35 = vrot.slane %v7810_v31, 7  ;;  %v3446_v56 = vmul.f32 %v7825_v13, %v7113_v14 }
 0x2b5   : > { %5672 = vmatmul.mubr.msk.f32.gmra.mrb[6].mxu0 %vm680_vm0, %v7886_v48  ;;  %v7933_v29 = vsel %vm929_vm3, %v3747_v38, %v3749_v36  ;;  %v7936_v54 = vsel %vm929_vm3, %v3749_v36, %v3751_v20  ;;  %v3463_v17 = vsel %vm538_vm1, %v3460_v9, %v3462_v0  ;;  %v3465_v63 = vsel %vm538_vm1, %v3462_v0, %v3464_v59  ;;  %v3891_v9 = vld [vmem:[%s8293_s10 + $0x68] sm:$0xff]  ;;  %v4009_v36 = vld [vmem:[%s8293_s10 + $0x80] sm:$0xff]  ;;  %v4011_v0 = vld [vmem:[%s8293_s10 + $0x90] sm:$0xff] }
 0x2b6   : > { %5682 = vmatprep.mubr.f32.mxu0 %v8333_v11  ;;  %v3753_v5 = vrot.slane %v3463_v17, 2  ;;  %v3755_v31 = vrot.slane %v3465_v63, 2  ;;  %v3467_v30 = vsel %vm538_vm1, %v3464_v59, %v3466_v35  ;;  %v3468_v14 = vrot.slane %v3446_v56, 7  ;;  %v3890_v11 = vld [vmem:[%s8293_s10 + $0x60] sm:$0xff]  ;;  %v4012_v59 = vld [vmem:[%s8293_s10 + $0x98] sm:$0xff]  ;;  %v4132_v56 = vld [vmem:[%s8293_s10 + $0xa8] sm:$0xff] }
 0x2b7   : > { %v3410_v62 = vsel %vm538_vm1, 0.0, %v3393_v55  ;;  %v3757_v23 = vrot.slane %v3467_v30, 2  ;;  %v7945_v49 = vmul.f32 %v7825_v13, %v7186_v24  ;;  %v7950_v10 = vsel %vm538_vm1, %v3433_v52, 0.0  ;;  %v4133_v63 = vld [vmem:[%s8293_s10 + $0xb0] sm:$0xff]  ;;  %v4253_v30 = vld [vmem:[%s8293_s10 + $0xc0] sm:$0xff] }
 0x2b8   : > { %v7959_v55 = vsel %vm929_vm3, %v3751_v20, %v3753_v5  ;;  %v7962_v41 = vsel %vm929_vm3, %v3753_v5, %v3755_v31  ;;  %v3469_v24 = vsel %vm538_vm1, %v3466_v35, %v3468_v14  ;;  %v4014_v13 = vrot.slane %v7950_v10, 1  ;;  %v4010_v20 = vld [vmem:[%s8293_s10 + $0x88] sm:$0xff]  ;;  %v4131_v35 = vld [vmem:[%s8293_s10 + $0xa0] sm:$0xff]  ;;  %v4134_v5 = vld [vmem:[%s8293_s10 + $0xb8] sm:$0xff] }
 0x2b9   : > { %5683 = vmatmul.mubr.msk.f32.vlgmr.msra.gmra.mrb[0].mxu0 %vm680_vm0, %v3410_v62  ;;  %v7968_v52 = vsel %vm929_vm3, %v3755_v31, %v3757_v23  ;;  %v3759_v19 = vrot.slane %v3469_v24, 2  ;;  %v3406_v51 = vrot.slane %v7945_v49, 7  ;;  %v7972_v4 = vsel %vm538_vm1, %v3468_v14, 0.0  ;;  %v4254_v14 = vld [vmem:[%s8293_s10 + $0xc8] sm:$0xff] }
 0x2ba   : > { %5997 = vmatpush3.bf16.msra.mxu0 %v7791_v8  ;;  %5685 = vmatprep.mubr.msk.f32.mxu0 %vm680_vm0, %v7869_v37  ;;  %v7982_v18 = vsel %vm662_vm2, %v3497_v39, %v4014_v13  ;;  %v4136_v27 = vrot.slane %v7972_v4, 2  ;;  %v6002_v38 = vpack.c.bf16 %v3891_v9, %v3890_v11  ;;  %v3893_v39 = vld [vmem:[%s8293_s10 + $0x78] sm:$0xff]  ;;  %v6018_v17 = vpack.c.bf16 %v4132_v56, %v4131_v35  ;;  %v4373_v9 = vld [vmem:[%s8293_s10 + $0xe0] sm:$0xff]  ;;  %v4374_v24 = vld [vmem:[%s8293_s10 + $0xe8] sm:$0xff] }
 0x2bb   : > { %5999 = vmatprep.subr.bf16.mxu0 %v5998_v46  ;;  %v7986_v47 = vsel %vm929_vm3, %v3757_v23, %v3759_v19  ;;  %v7993_v8 = vsel %vm538_vm1, %v3404_v16, %v3406_v51  ;;  %v3746_v16 = vsel %vm929_vm3, %v8336_v44, %v3745_v32  ;;  %v6006_v45 = vpack.c.bf16 %v3893_v39, %v3892_v60  ;;  %v4256_v23 = vld [vmem:[%s8293_s10 + $0xd8] sm:$0xff]  ;;  %v4493_v39 = vld [vmem:[%s8293_s10 + $0x100] sm:$0xff] }
 0x2bc   : > { %v7998_v34 = vsel %vm929_vm3, %v3759_v19, %v4136_v27  ;;  %v6010_v32 = vpack.c.bf16 %v4010_v20, %v4009_v36  ;;  %v6022_v31 = vpack.c.bf16 %v4134_v5, %v4133_v63  ;;  %v6034_v19 = vpack.c.bf16 %v4374_v24, %v4373_v9 }
 0x2bd   : > { %5686 = vmatmul.mubr.msk.f32.gmra.mrb[2].mxu0 %vm680_vm0, %v7872_v7 }
 0x2be   : > { %5688 = vmatprep.mubr.msk.f32.mxu0 %vm680_vm0, %v7894_v12  ;;  %6001 = vmatpush3.bf16.msra.mxu0 %v5998_v46  ;;  %v6014_v46 = vpack.c.bf16 %v4012_v59, %v4011_v0 }
 0x2bf   : > { %6003 = vmatprep.subr.bf16.mxu0 %v6002_v38 }
 0x2c1   : > { %5689 = vmatmul.mubr.msk.f32.gmra.mrb[4].mxu0 %vm680_vm0, %v7897_v15 }
 0x2c2   : > { %5691 = vmatprep.mubr.msk.f32.mxu0 %vm680_vm0, %v7911_v57 }
 0x2c5   : > { %5692 = vmatmul.mubr.msk.f32.gmra.mrb[6].mxu0 %vm680_vm0, %v7916_v3 }
 0x2c6   : > { %5702 = vmatprep.mubr.msk.f32.mxu0 %vm680_vm0, %v3746_v16  ;;  %v4494_v16 = vld [vmem:[%s8293_s10 + $0x108] sm:$0xff] }
 0x2c9   : > { %5703 = vmatmul.mubr.msk.f32.vlgmr.msra.gmra.mrb[0].mxu0 %vm680_vm0, %v7925_v25 }
 0x2ca   : > { %6005 = vmatpush3.bf16.msra.mxu0 %v6002_v38  ;;  %5705 = vmatprep.mubr.msk.f32.mxu0 %vm680_vm0, %v7933_v29  ;;  %v4376_v38 = vld [vmem:[%s8293_s10 + $0xf8] sm:$0xff] }
 0x2cb   : > { %6007 = vmatprep.subr.bf16.mxu0 %v6006_v45 }
 0x2cd   : > { %5706 = vmatmul.mubr.msk.f32.gmra.mrb[2].mxu0 %vm680_vm0, %v7936_v54 }
 0x2ce   : > { %5708 = vmatprep.mubr.msk.f32.mxu0 %vm680_vm0, %v7959_v55  ;;  %6009 = vmatpush3.bf16.msra.mxu0 %v6006_v45  ;;  %v6042_v45 = vpack.c.bf16 %v4494_v16, %v4493_v39 }
 0x2cf   : > { %6011 = vmatprep.subr.bf16.mxu0 %v6010_v32 }
 0x2d1   : > { %5709 = vmatmul.mubr.msk.f32.gmra.mrb[4].mxu0 %vm680_vm0, %v7962_v41 }
 0x2d2   : > { %5711 = vmatprep.mubr.msk.f32.mxu0 %vm680_vm0, %v7968_v52 }
 0x2d5   : > { %5712 = vmatmul.mubr.msk.f32.gmra.mrb[6].mxu0 %vm680_vm0, %v7986_v47 }
 0x2d6   : > { %5722 = vmatprep.mubr.msk.f32.mxu0 %vm680_vm0, %v3410_v62  ;;  %v6026_v62 = vpack.c.bf16 %v4254_v14, %v4253_v30 }
 0x2d9   : > { %5723 = vmatmul.mubr.msk.f32.vlgmr.msra.gmra.mrb[0].mxu0 %vm680_vm0, %v7869_v37 }
 0x2da   : > { %6013 = vmatpush3.bf16.msra.mxu0 %v6010_v32  ;;  %5725 = vmatprep.mubr.msk.f32.mxu0 %vm680_vm0, %v7872_v7 }
 0x2db   : > { %6015 = vmatprep.subr.bf16.mxu0 %v6014_v46 }
 0x2dd   : > { %5726 = vmatmul.mubr.msk.f32.gmra.mrb[2].mxu0 %vm680_vm0, %v7894_v12 }
 0x2de   : > { %5728 = vmatprep.mubr.msk.f32.mxu0 %vm680_vm0, %v7897_v15  ;;  %6017 = vmatpush3.bf16.msra.mxu0 %v6014_v46 }
 0x2df   : > { %6019 = vmatprep.subr.bf16.mxu0 %v6018_v17 }
 0x2e1   : > { %5729 = vmatmul.mubr.msk.f32.gmra.mrb[4].mxu0 %vm680_vm0, %v7911_v57 }
 0x2e2   : > { %5731 = vmatprep.mubr.msk.f32.mxu0 %vm680_vm0, %v7916_v3 }
 0x2e5   : > { %5732 = vmatmul.mubr.msk.f32.gmra.mrb[6].mxu0 %vm680_vm0, %v7993_v8 }
 0x2e6   : > { %5742 = vmatprep.mubr.msk.f32.mxu0 %vm680_vm0, %v7830_v58  ;;  %v4255_v58 = vld [vmem:[%s8293_s10 + $0xd0] sm:$0xff] }
 0x2e7   : > { %v6030_v11 = vpack.c.bf16 %v4256_v23, %v4255_v58 }
 0x2e9   : > { %5743 = vmatmul.mubr.msk.f32.vlgmr.msra.gmra.mrb[0].mxu0 %vm680_vm0, %v7835_v26 }
 0x2ea   : > { %6021 = vmatpush3.bf16.msra.mxu0 %v6018_v17  ;;  %5745 = vmatprep.mubr.msk.f32.mxu0 %vm680_vm0, %v7842_v6 }
 0x2eb   : > { %6023 = vmatprep.subr.bf16.mxu0 %v6022_v31 }
 0x2ed   : > { %5746 = vmatmul.mubr.msk.f32.gmra.mrb[2].mxu0 %vm680_vm0, %v7849_v28 }
 0x2ee   : > { %5748 = vmatprep.mubr.msk.f32.mxu0 %vm680_vm0, %v7855_v2  ;;  %6025 = vmatpush3.bf16.msra.mxu0 %v6022_v31 }
 0x2ef   : > { %6027 = vmatprep.subr.bf16.mxu0 %v6026_v62 }
 0x2f1   : > { %5749 = vmatmul.mubr.msk.f32.gmra.mrb[4].mxu0 %vm680_vm0, %v7858_v53 }
 0x2f2   : > { %5751 = vmatprep.mubr.msk.f32.mxu0 %vm680_vm0, %v7886_v48 }
 0x2f5   : > { %5752 = vmatmul.mubr.msk.f32.gmra.mrb[6].mxu0 %vm680_vm0, %v7982_v18 }
 0x2f6   : > { %5762 = vmatprep.mubr.msk.f32.mxu0 %vm680_vm0, %v7925_v25  ;;  %v4375_v25 = vld [vmem:[%s8293_s10 + $0xf0] sm:$0xff] }
 0x2f7   : > { %v6038_v60 = vpack.c.bf16 %v4376_v38, %v4375_v25 }
 0x2f9   : > { %5763 = vmatmul.mubr.msk.f32.vlgmr.msra.gmra.mrb[0].mxu0 %vm680_vm0, %v7933_v29 }
 0x2fa   : > { %6029 = vmatpush3.bf16.msra.mxu0 %v6026_v62  ;;  %5765 = vmatprep.mubr.msk.f32.mxu0 %vm680_vm0, %v7936_v54 }
 0x2fb   : > { %6031 = vmatprep.subr.bf16.mxu0 %v6030_v11 }
 0x2fd   : > { %5766 = vmatmul.mubr.msk.f32.gmra.mrb[2].mxu0 %vm680_vm0, %v7959_v55 }
 0x2fe   : > { %5768 = vmatprep.mubr.msk.f32.mxu0 %vm680_vm0, %v7962_v41  ;;  %6033 = vmatpush3.bf16.msra.mxu0 %v6030_v11 }
 0x2ff   : > { %6035 = vmatprep.subr.bf16.mxu0 %v6034_v19 }
 0x301   : > { %5769 = vmatmul.mubr.msk.f32.gmra.mrb[4].mxu0 %vm680_vm0, %v7968_v52 }
 0x302   : > { %5771 = vmatprep.mubr.msk.f32.mxu0 %vm680_vm0, %v7986_v47 }
 0x305   : > { %5772 = vmatmul.mubr.msk.f32.gmra.mrb[6].mxu0 %vm680_vm0, %v7998_v34 }
 0x306   : > { %5782 = vmatprep.mubr.msk.f32.mxu0 %vm680_vm0, %v7869_v37  ;;  %v3411_v37 = vsel %vm538_vm1, %v3406_v51, 0.0 }
 0x309   : > { %5783 = vmatmul.mubr.msk.f32.vlgmr.msra.gmra.mrb[0].mxu0 %vm680_vm0, %v7872_v7  ;;  %v4495_v7 = vld [vmem:[%s8293_s10 + $0x110] sm:$0xff] }
 0x30a   : > { %6037 = vmatpush3.bf16.msra.mxu0 %v6034_v19  ;;  %5785 = vmatprep.mubr.msk.f32.mxu0 %vm680_vm0, %v7894_v12  ;;  %v4496_v12 = vld [vmem:[%s8293_s10 + $0x118] sm:$0xff] }
 0x30b   : > { %6039 = vmatprep.subr.bf16.mxu0 %v6038_v60 }
 0x30d   : > { %5786 = vmatmul.mubr.msk.f32.gmra.mrb[2].mxu0 %vm680_vm0, %v7897_v15  ;;  %v6046_v15 = vpack.c.bf16 %v4496_v12, %v4495_v7 }
 0x30e   : > { %5788 = vmatprep.mubr.msk.f32.mxu0 %vm680_vm0, %v7911_v57  ;;  %6041 = vmatpush3.bf16.msra.mxu0 %v6038_v60 }
 0x30f   : > { %6043 = vmatprep.subr.bf16.mxu0 %v6042_v45 }
 0x311   : > { %5789 = vmatmul.mubr.msk.f32.gmra.mrb[4].mxu0 %vm680_vm0, %v7916_v3 }
 0x312   : > { %5791 = vmatprep.mubr.msk.f32.mxu0 %vm680_vm0, %v7993_v8 }
 0x315   : > { %5792 = vmatmul.mubr.msk.f32.gmra.mrb[6].mxu0 %vm680_vm0, %v3411_v37 }
 0x316   : > { %5802 = vmatprep.mubr.msk.f32.mxu0 %vm680_vm0, %v7835_v26  ;;  %v4377_v26 = vsel %vm662_vm2, %v4014_v13, %v6658_v21  ;;  %v4497_v21 = vsel %vm929_vm3, %v4136_v27, %v8336_v44 }
 0x319   : > { %5803 = vmatmul.mubr.msk.f32.vlgmr.msra.gmra.mrb[0].mxu0 %vm680_vm0, %v7842_v6  ;;  %v4798_v6 = vld [vmem:[%s8296_s13] ss:$0 sm:$0xff] }
 0x31a   : > { %6045 = vmatpush3.bf16.msra.mxu0 %v6042_v45  ;;  %5805 = vmatprep.mubr.msk.f32.mxu0 %vm680_vm0, %v7849_v28  ;;  %v6054_v28 = vadd.f32 %v7698_v40, %v4798_v6  ;;  %v6063_v49 = vadd.f32 %v4798_v6, %v7704_v33  ;;  %v6069_v13 = vadd.f32 %v4798_v6, %v7708_v1 }
 0x31b   : > { %6047 = vmatprep.subr.bf16.mxu0 %v6046_v15 }
 0x31d   : > { %5806 = vmatmul.mubr.msk.f32.gmra.mrb[2].mxu0 %vm680_vm0, %v7855_v2  ;;  %v6057_v2 = vadd.f32 %v4798_v6, %v7700_v50 }
 0x31e   : > { %5808 = vmatprep.mubr.msk.f32.mxu0 %vm680_vm0, %v7858_v53  ;;  %6049 = vmatpush3.bf16.msra.mxu0 %v6046_v15 }
 0x321   : > { %5809 = vmatmul.mubr.msk.f32.gmra.mrb[4].mxu0 %vm680_vm0, %v7886_v48  ;;  %v4962_v48 = vld [vmem:[%s8294_s11] ss:$0 sm:$0xff] }
 0x322   : > { %5811 = vmatprep.mubr.msk.f32.mxu0 %vm680_vm0, %v7982_v18 }
 0x325   : > { %5812 = vmatmul.mubr.msk.f32.gmra.mrb[6].mxu0 %vm680_vm0, %v4377_v26 }
 0x326   : > { %5822 = vmatprep.mubr.msk.f32.mxu0 %vm680_vm0, %v7933_v29  ;;  %v6060_v29 = vadd.f32 %v7702_v42, %v4798_v6  ;;  %v6066_v42 = vadd.f32 %v7706_v22, %v4798_v6  ;;  %v6075_v22 = vadd.f32 %v4798_v6, %v7712_v61 }
 0x329   : > { %5823 = vmatmul.mubr.msk.f32.vlgmr.msra.gmra.mrb[0].mxu0 %vm680_vm0, %v7936_v54 }
 0x32a   : > { %5825 = vmatprep.mubr.msk.f32.mxu0 %vm680_vm0, %v7959_v55 }
 0x32d   : > { %5826 = vmatmul.mubr.msk.f32.gmra.mrb[2].mxu0 %vm680_vm0, %v7962_v41 }
 0x32e   : > { %5828 = vmatprep.mubr.msk.f32.mxu0 %vm680_vm0, %v7968_v52 }
 0x331   : > { %5829 = vmatmul.mubr.msk.f32.gmra.mrb[4].mxu0 %vm680_vm0, %v7986_v47  ;;  %v6072_v47 = vadd.f32 %v7710_v43, %v4798_v6 }
 0x332   : > { %5831 = vmatprep.mubr.msk.f32.mxu0 %vm680_vm0, %v7998_v34 }
 0x335   : > { %5832 = vmatmul.mubr.msk.f32.gmra.mrb[6].mxu0 %vm680_vm0, %v4497_v21 }
 0x3fc   : > { %v5824_v53 = vpop.f32.mrb[0].mxu0 }
 0x3fd   : > { %v6055_v57 = vadd.f32 %v6054_v28, %v5824_v53  ;;  %v4566_v44 = vpop.f32.mrb[1].mxu0 }
 0x3fe   : > { %v6058_v3 = vadd.f32 %v6057_v2, %v4566_v44 }
 0x3ff   : > { %v6056_v54 = vadd.f32 %v6055_v57, %v4962_v48 }
 0x400   : > { %v6059_v10 = vadd.f32 %v6058_v3, %v4962_v48  ;;  %v5827_v55 = vpop.f32.mrb[2].mxu0 }
 0x401   : > { %4637 = vst.msk [vmem:[%s8209_s3 + $0x8] sm:$0xff] %vm680_vm0, %v6056_v54  ;;  %v6061_v40 = vadd.f32 %v6060_v29, %v5827_v55  ;;  %v4576_v50 = vpop.f32.mrb[3].mxu0 }
 0x402   : > { %4636 = vst.msk [vmem:[%s8209_s3] sm:$0xff] %vm680_vm0, %v6059_v10  ;;  %v6064_v41 = vadd.f32 %v6063_v49, %v4576_v50 }
 0x403   : > { %v6062_v33 = vadd.f32 %v6061_v40, %v4962_v48 }
 0x404   : > { %v6065_v52 = vadd.f32 %v6064_v41, %v4962_v48  ;;  %v5830_v51 = vpop.f32.mrb[4].mxu0 }
 0x405   : > { %4639 = vst.msk [vmem:[%s8209_s3 + $0x18] sm:$0xff] %vm680_vm0, %v6062_v33  ;;  %v6067_v4 = vadd.f32 %v6066_v42, %v5830_v51  ;;  %v4586_v18 = vpop.f32.mrb[5].mxu0 }
 0x406   : > { %4638 = vst.msk [vmem:[%s8209_s3 + $0x10] sm:$0xff] %vm680_vm0, %v6065_v52  ;;  %v6070_v27 = vadd.f32 %v6069_v13, %v4586_v18 }
 0x407   : > { %v6068_v8 = vadd.f32 %v6067_v4, %v4962_v48 }
 0x408   : > { %v6071_v34 = vadd.f32 %v6070_v27, %v4962_v48  ;;  %v5833_v1 = vpop.f32.mrb[6].mxu0 }
 0x409   : > { %4641 = vst.msk [vmem:[%s8209_s3 + $0x28] sm:$0xff] %vm680_vm0, %v6068_v8  ;;  %v6073_v36 = vadd.f32 %v6072_v47, %v5833_v1  ;;  %v4596_v20 = vpop.f32.mrb[7].mxu0 }
 0x40a   : > { %4640 = vst.msk [vmem:[%s8209_s3 + $0x20] sm:$0xff] %vm680_vm0, %v6071_v34  ;;  %v6076_v32 = vadd.f32 %v6075_v22, %v4596_v20 }
 0x40b   : > { %v6074_v0 = vadd.f32 %v6073_v36, %v4962_v48 }
 0x40c   : > { %v6077_v43 = vadd.f32 %v6076_v32, %v4962_v48 }
 0x40d   : > { %4643 = vst.msk [vmem:[%s8209_s3 + $0x38] sm:$0xff] %vm680_vm0, %v6074_v0 }
 0x40e   : > { %4642 = vst.msk [vmem:[%s8209_s3 + $0x30] sm:$0xff] %vm680_vm0, %v6077_v43 }
 0x40f   : > { %6401 = shalt.err (!%p6398_p3)
}
 0x410   : > { %s6402_s16 = scalar_lea.hbm %s8232_s2, 1024  ;;  %s6406_s22 = scalar_lea.hbm %s8297_s14, 2048 }
 0x411   : > { %p6403_p4 = scmp.ne.s32.totalorder %s8232_s2, %s6402_s16  ;;  %p6407_p9 = scmp.lt.u32.totalorder %s8232_s2, %s8297_s14 }
 0x412   : > { %p6408_p10 = scmp.lt.u32.totalorder %s6406_s22, %s6402_s16  ;;  %p6410_p12 = scmp.lt.u32.totalorder %s6402_s16, %s8232_s2 }
 0x413   : > { %p6404_p7 = pnand %p6403_p4, %p6571_p5 }
 0x414   : > { %p6409_p11 = por %p6408_p10, %p6407_p9 }
 0x415   : > { %p6405_p8 = pneg %p6404_p7 }
 0x416   : > { %p6411_p13 = por %p6410_p12, %p6409_p11 }
 0x418   : > { %p6412_p0 = pnand %p6411_p13, %p6405_p8 }
 0x41a   : > { %6415 = shalt.err (!%p6412_p0)
}
 0x41b   : > { %s6456_s18 = smov 128   ;;  %s6457_s21 = smov 8  }
 0x41c   : > { %6270 = dma.vmem_to_hbm [thread:$0]  (%p6571_p5), %s8234_s25, 1024, %s8232_s2, %s8242_s15, %s6456_s18, %s6456_s18, %s6457_s21  }
 0x41d PF: > { %p6276_p1 = scmp.ge.s32.totalorder %s6450_s30, 2  ;;  %s4673_s23 = sand.u32 1, %s6438_s27  }
 0x41e   : > { %s4674_s24 = scalar_lea.sflag [#allocation3], %s4673_s23 }
 0x41f   : > { %p6273_p2 = pnand %p6276_p1, %p6575_p6 }
 0x421   : > { %6433 = dma.done.wait (!%p6273_p2), %s4674_s24, 1024  }
 0x422   : > { %6435 = vsyncadd (!%p6273_p2), %s4674_s24, 4294966272  ;;  %s8341_s30 = sld [smem:[#allocation6_spill]]  ;;  %s8342_s16 = sld [smem:[#allocation5_spill]] }
 0x423   : > { %s8343_s29 = sld [smem:[#allocation7_spill]]  ;;  %s8344_s27 = smov %s6442_s28 }
 0x428   : > { %p24_p3 = scmp.ge.s32.totalorder %s8341_s30, 4   ;;  %s8345_s28 = smov %s8342_s16 }
 0x42a   :  { %26 = sbr.rel (!%p24_p3) target bundleno = 3 (0x3), region = 111 }
 0x431   :  { %4679 = vsyncpa [#allocation3], 1 }
 0x432   :  { %4681 = vsyncpa [#allocation3 + $0x1], 1 }

</bundles_post_ra>
